<compile_context>
chip_gen: v7x
topology: tpu7x:2x2x1
jax: 0.10.0
libtpu: 0.0.40
codegen_flags: <defaults>
</compile_context>

<pallas_src>
import functools

import jax
import jax.numpy as jnp
from jax.experimental import pallas as pl
from jax.experimental.pallas import tpu as pltpu

TOPK = 4  # filter_mode = 'TopK_4'


# ----------------------------- per-generation tuning -----------------------------

def _tpu_kind():
    try:
        return jax.devices()[0].device_kind.lower()
    except Exception:
        return "unknown"


_KIND = _tpu_kind()
if "v5" in _KIND:
    # 128 MiB VMEM; 4x128^2 MXU -> 128-granular tiles, big blocks.
    _VMEM_LIMIT_BYTES = 96 * 1024 * 1024
    _ROW_GRANULES, _LANE_GRANULES = (128, 8), (128,)
    _ROW_CAP, _LANE_CAP = 1024, 1024
elif "v6" in _KIND:
    # 128 MiB VMEM; 2x256^2 MXU -> prefer 256-granular tiles, big blocks.
    _VMEM_LIMIT_BYTES = 96 * 1024 * 1024
    _ROW_GRANULES, _LANE_GRANULES = (256, 128, 8), (256, 128)
    _ROW_CAP, _LANE_CAP = 1024, 1024
else:
    # v7x (64 MiB VMEM per TC) or unknown backend: stay conservative.
    _VMEM_LIMIT_BYTES = 40 * 1024 * 1024
    _ROW_GRANULES, _LANE_GRANULES = (256, 128, 8), (256, 128)
    _ROW_CAP, _LANE_CAP = 512, 512


def _cparams(*sems):
    return pltpu.CompilerParams(dimension_semantics=sems,
                                vmem_limit_bytes=_VMEM_LIMIT_BYTES)


def _pick_tile(n, cap, granules):
    """Largest divisor of n that is <= cap and aligned to the coarsest workable granule."""
    for g in granules:
        c = (min(cap, n) // g) * g
        while c >= g:
            if n % c == 0:
                return c
            c -= g
    # TODO(synk): pad N to a tiling-friendly size instead of falling back to one block.
    return n


def _row_tile(n):
    return _pick_tile(n, min(_ROW_CAP, max(n // 2, 8)), _ROW_GRANULES)


def _lane_tile(n):
    return _pick_tile(n, _LANE_CAP, _LANE_GRANULES)


# ----------------------------- Pallas kernels -----------------------------

def _matmul_kernel(a_ref, b_ref, o_ref):
    o_ref[...] = jnp.dot(a_ref[...], b_ref[...],
                         preferred_element_type=jnp.float32).astype(o_ref.dtype)


def matmul_pl(a, b, out_dtype=jnp.bfloat16):
    """Row/column tiled matmul (contraction dim is tiny here, so it stays whole)."""
    M, Kc = a.shape
    Kc2, Nc = b.shape
    assert Kc == Kc2
    tm, tn = _row_tile(M), _lane_tile(Nc)
    return pl.pallas_call(
        _matmul_kernel,
        out_shape=jax.ShapeDtypeStruct((M, Nc), out_dtype),
        grid=(M // tm, Nc // tn),
        in_specs=[
            pl.BlockSpec((tm, Kc), lambda i, j: (i, 0)),
            pl.BlockSpec((Kc, tn), lambda i, j: (0, j)),
        ],
        out_specs=pl.BlockSpec((tm, tn), lambda i, j: (i, j)),
        compiler_params=_cparams("parallel", "parallel"),
    )(a, b)


def _adj_builder_kernel(topk_ref, tdst_ref, tsrc_ref, cs_ref, din_ref, aori_ref,
                        o_ref, *, tm, tn, k):
    # Slot 1:  a_hat[dst, src] = cnt(dst,src) * <t[dst],t[src]> / (seg[src]*sqrt(K+1))
    #                            / sqrt(d_in[dst])
    # Slot 0:  bf16 cast of the original-graph normalized adjacency (pass-through).
    row0 = pl.program_id(0) * tm
    col0 = pl.program_id(1) * tn
    dst = jax.lax.broadcasted_iota(jnp.int32, (tm, 1), 0) + row0
    src = jax.lax.broadcasted_iota(jnp.int32, (tm, tn), 1) + col0
    # cnt counts parallel edges: explicit self loop + each topk hit (matches DGL
    # add_self_loop on a multigraph: diagonal can be 2 when i is in topk(i)).
    cnt = (src == dst).astype(jnp.float32)
    for kk in range(k):                                   # static unroll, K = 4
        cnt = cnt + (topk_ref[pl.ds(kk, 1), :] == dst).astype(jnp.float32)
    # S tile computed in-kernel on the MXU (no (N,N) S round trip through HBM).
    s = jnp.dot(tdst_ref[...], tsrc_ref[...], preferred_element_type=jnp.float32)
    a = cnt * s * cs_ref[...] * din_ref[...]
    o_ref[0] = aori_ref[...].astype(o_ref.dtype)
    o_ref[1] = a.astype(o_ref.dtype)


def build_stacked_adjacency(topk_idx, t_bf, tT_bf, col_scale, inv_sqrt_din, a_hat_ori):
    """Column-tiled, lane-dense build of the stacked (ori, NtN) bf16 adjacencies."""
    N, K = topk_idx.shape
    T = t_bf.shape[1]
    tm, tn = _row_tile(N), _lane_tile(N)
    topk_t = jnp.transpose(topk_idx).astype(jnp.int32)    # (K, N): lane-dense per k
    return pl.pallas_call(
        functools.partial(_adj_builder_kernel, tm=tm, tn=tn, k=K),
        out_shape=jax.ShapeDtypeStruct((2, N, N), jnp.bfloat16),
        grid=(N // tm, N // tn),
        in_specs=[
            pl.BlockSpec((K, tn), lambda i, j: (0, j)),    # topk (by src column)
            pl.BlockSpec((tm, T), lambda i, j: (i, 0)),    # t rows (dst)
            pl.BlockSpec((T, tn), lambda i, j: (0, j)),    # t.T cols (src)
            pl.BlockSpec((1, tn), lambda i, j: (0, j)),    # 1/(seg*sqrt(K+1)) per src
            pl.BlockSpec((tm, 1), lambda i, j: (i, 0)),    # rsqrt(d_in) per dst
            pl.BlockSpec((tm, tn), lambda i, j: (i, j)),   # original normalized adjacency
        ],
        out_specs=pl.BlockSpec((2, tm, tn), lambda i, j: (0, i, j)),
        compiler_params=_cparams("parallel", "parallel"),
    )(topk_t, t_bf, tT_bf, col_scale, inv_sqrt_din, a_hat_ori)


def _gcn_layer1_kernel(a_ref, xw_ref, b1_ref, w2_ref, o_ref, acc_ref):
    # acc = sum_k A[g, i, k] @ XW1[k]   (f32 accumulation over the K-tiled contraction)
    @pl.when(pl.program_id(2) == 0)
    def _():
        acc_ref[...] = jnp.zeros_like(acc_ref)

    acc_ref[...] += jnp.dot(a_ref[...], xw_ref[...],
                            preferred_element_type=jnp.float32)

    @pl.when(pl.program_id(2) == pl.num_programs(2) - 1)
    def _():
        h = jnp.maximum(acc_ref[...] + b1_ref[...], 0.0)          # relu(A@XW1 + b1)
        o_ref[...] = jnp.dot(h.astype(w2_ref.dtype), w2_ref[...],
                             preferred_element_type=jnp.float32).astype(o_ref.dtype)


def gcn_layer1(a_stack_bf, xw1_bf, b1, w2_bf):
    """Fused GraphConv layer 1 + layer-2 weight projection, batched over both graphs."""
    G, N, _ = a_stack_bf.shape
    H = xw1_bf.shape[1]
    C = w2_bf.shape[1]
    tm, tk = _row_tile(N), _lane_tile(N)
    return pl.pallas_call(
        _gcn_layer1_kernel,
        out_shape=jax.ShapeDtypeStruct((G, N, C), jnp.bfloat16),
        grid=(G, N // tm, N // tk),
        in_specs=[
            pl.BlockSpec((None, tm, tk), lambda g, i, k: (g, i, k)),
            pl.BlockSpec((tk, H), lambda g, i, k: (k, 0)),
            pl.BlockSpec((1, H), lambda g, i, k: (0, 0)),
            pl.BlockSpec((H, C), lambda g, i, k: (0, 0)),
        ],
        out_specs=pl.BlockSpec((None, tm, C), lambda g, i, k: (g, i, 0)),
        scratch_shapes=[pltpu.VMEM((tm, H), jnp.float32)],
        compiler_params=_cparams("parallel", "parallel", "arbitrary"),
    )(a_stack_bf, xw1_bf, b1, w2_bf)


def _gcn_layer2_kernel(a_ref, hw_ref, b2_ref, o_ref, acc_ref):
    @pl.when(pl.program_id(2) == 0)
    def _():
        acc_ref[...] = jnp.zeros_like(acc_ref)

    acc_ref[...] += jnp.dot(a_ref[...], hw_ref[...],
                            preferred_element_type=jnp.float32)

    @pl.when(pl.program_id(2) == pl.num_programs(2) - 1)
    def _():
        h = acc_ref[...] + b2_ref[...]
        ss = jnp.sum(h * h, axis=-1, keepdims=True)
        # F.normalize(p=2, dim=1): x / max(||x||, 1e-12), via EUP rsqrt
        o_ref[...] = h * jax.lax.rsqrt(jnp.maximum(ss, 1e-24))


def gcn_layer2_norm(a_stack_bf, h1w2_bf, b2):
    """GraphConv layer 2 (A @ (h1@W2) + b2) with fused row-L2 norm, batched over graphs."""
    G, N, _ = a_stack_bf.shape
    C = h1w2_bf.shape[2]
    tm, tk = _row_tile(N), _lane_tile(N)
    return pl.pallas_call(
        _gcn_layer2_kernel,
        out_shape=jax.ShapeDtypeStruct((G, N, C), jnp.float32),
        grid=(G, N // tm, N // tk),
        in_specs=[
            pl.BlockSpec((None, tm, tk), lambda g, i, k: (g, i, k)),
            pl.BlockSpec((None, tk, C), lambda g, i, k: (g, k, 0)),
            pl.BlockSpec((1, C), lambda g, i, k: (0, 0)),
        ],
        out_specs=pl.BlockSpec((None, tm, C), lambda g, i, k: (g, i, 0)),
        scratch_shapes=[pltpu.VMEM((tm, C), jnp.float32)],
        compiler_params=_cparams("parallel", "parallel", "arbitrary"),
    )(a_stack_bf, h1w2_bf, b2)


# ----------------------------- model glue -----------------------------

def init_params(key, n_feat, n_hidden, n_class, att_hidden=128):
    ks = jax.random.split(key, 4)

    def lin(k, fin, fout):
        return (jax.random.normal(k, (fin, fout), jnp.float32) / jnp.sqrt(fin)).astype(
            jnp.float32
        )

    return {
        "gcn_w1": lin(ks[0], n_feat, n_hidden),
        "gcn_b1": jnp.zeros((1, n_hidden), jnp.float32),
        "gcn_w2": lin(ks[1], n_hidden, n_class),
        "gcn_b2": jnp.zeros((1, n_class), jnp.float32),
        "att_w1": lin(ks[2], n_class, att_hidden),    # SemanticAttention Linear(C, 128)
        "att_b1": jnp.zeros((1, att_hidden), jnp.float32),
        "att_w2": lin(ks[3], att_hidden, 1),          # Linear(128, 1, bias=False)
    }


def _row_norm(x):
    return x / jnp.maximum(jnp.sum(x, axis=1, keepdims=True), 1e-12)


def mgsl_kge_forward(params, features, ndata_t, a_hat_ori):
    N, T = ndata_t.shape
    K = TOPK

    t_bf = ndata_t.astype(jnp.bfloat16)
    tT_bf = jnp.transpose(ndata_t).astype(jnp.bfloat16)

    # --- _get_gmvr (adj_norm=True); only the 'Nt'/'tN' meta relations are needed ---
    rn_nt = _row_norm(ndata_t).astype(jnp.bfloat16)      # gmvr['Nt']  (N, T)
    rn_tn = _row_norm(ndata_t.T).astype(jnp.bfloat16)    # gmvr['tN']  (T, N)

    # --- coarse_filter_cand_graphs for metapath 'NtN' (TopK_4 + self loops) ---
    adj_cand = matmul_pl(rn_nt, rn_tn, out_dtype=jnp.bfloat16)   # (N, N) bf16
    _, topk_idx = jax.lax.top_k(adj_cand, K)                     # (N, K) int32

    # --- per-edge metapath weights (ori_implementation=True) ---
    # edge weight(src, dst) = <t[src], t[dst]>; edge_weight_norm groups by src:
    # seg[src] = sum_{dst in topk(src)} <t[src],t[dst]> + <t[src],t[src]> (self loop).
    t_nb = jnp.take(ndata_t, topk_idx, axis=0)                   # (N, K, T) — tiny gather
    seg = jnp.einsum("nkt,nt->n", t_nb, ndata_t) + jnp.sum(ndata_t * ndata_t, axis=1)
    seg = jnp.maximum(seg, 1e-12)                                # guard all-zero t rows
    # GraphConv norm='both' structural degrees: d_out = K+1; d_in = topk scatter + 1
    d_in = jnp.zeros((N,), jnp.float32).at[topk_idx.reshape(-1)].add(1.0) + 1.0
    col_scale = (1.0 / (seg * (float(K + 1) ** 0.5))).reshape(1, N)
    inv_sqrt_din = jax.lax.rsqrt(d_in).reshape(N, 1)

    # Stacked bf16 adjacencies: slot 0 = 'ori' (cast), slot 1 = weighted TopK 'NtN'.
    a_stack = build_stacked_adjacency(topk_idx, t_bf, tT_bf, col_scale,
                                      inv_sqrt_din, a_hat_ori)   # (2, N, N) bf16

    # --- shared 2-layer GCN, batched over both candidate graphs ---
    xw1 = matmul_pl(features.astype(jnp.bfloat16),
                    params["gcn_w1"].astype(jnp.bfloat16),
                    out_dtype=jnp.bfloat16)                      # (N, H) bf16, shared
    w2_bf = params["gcn_w2"].astype(jnp.bfloat16)
    h1w2 = gcn_layer1(a_stack, xw1, params["gcn_b1"], w2_bf)     # (2, N, C) bf16
    z = gcn_layer2_norm(a_stack, h1w2, params["gcn_b2"])         # (2, N, C) f32, L2-normed

    # --- SemanticAttention beta (tiny global reduction; XLA) ---
    zt = jnp.transpose(z, (1, 0, 2))                             # (N, M=2, C)
    s = jnp.tanh(zt @ params["att_w1"] + params["att_b1"]) @ params["att_w2"]  # (N, 2, 1)
    beta = jax.nn.softmax(jnp.mean(s, axis=0).reshape(-1))       # (M,)

    # --- beta-weighted combination: tiny (N, C); left to XLA fusion (per perf review) ---
    logits = beta[0] * z[0] + beta[1] * z[1]                     # (N, C)
    return logits, beta


# ----------------------------- main -----------------------------

if __name__ == "__main__":
    N, F, H, C, T = 128, 64, 32, 8, 16

    key = jax.random.PRNGKey(0)
    k_feat, k_t, k_adj, k_param = jax.random.split(key, 4)

    features = jax.random.normal(k_feat, (N, F), jnp.float32)
    ndata_t = jax.random.uniform(k_t, (N, T), jnp.float32)   # g.ndata['t'] meta sources

    # deterministic original graph -> dense GraphConv('both') normalized adjacency
    a = (jax.random.uniform(k_adj, (N, N)) < 0.05).astype(jnp.float32)
    a = jnp.maximum(a, a.T)
    a = jnp.maximum(a, jnp.eye(N, dtype=jnp.float32))        # self loops
    d_in = jnp.clip(jnp.sum(a, axis=1), 1.0, None)
    d_out = jnp.clip(jnp.sum(a, axis=0), 1.0, None)
    a_hat_ori = a / jnp.sqrt(d_in)[:, None] / jnp.sqrt(d_out)[None, :]

    params = init_params(k_param, F, H, C)

    fwd = jax.jit(mgsl_kge_forward)
    logits, beta = fwd(params, features, ndata_t, a_hat_ori)
    jax.block_until_ready(logits)
    jax.block_until_ready(beta)

    # process_attention_weight equivalent
    att_weights = dict(zip(["ori", "NtN"], [float(b) for b in beta]))
    assert logits.shape == (N, C)
    assert len(att_weights) == 2
    assert bool(jnp.all(jnp.isfinite(logits)))

    print("KERNEL_OK")
</pallas_src>

<mosaic_0001>
module attributes {stable_mosaic.version = 11 : i64} {
  func.func private @main(%arg0: i32) attributes {dimension_semantics = [#tpu.dimension_semantics<core_parallel>], iteration_bounds = array<i64: 2>, tpu.core_type = #tpu.core_type<sc_scalar_subcore>, window_params = []} {
    return
  }
}

module attributes {stable_mosaic.version = 11 : i64} {
  func.func private @main(%arg0: i32) attributes {dimension_semantics = [#tpu.dimension_semantics<core_parallel>], iteration_bounds = array<i64: 2>, tpu.core_type = #tpu.core_type<sc_scalar_subcore>, window_params = []} {
    return
  }
}

module attributes {stable_mosaic.version = 11 : i64} {
  func.func @_matmul_kernel(%arg0: i32, %arg1: i32, %arg2: memref<64x16xbf16, #tpu.memory_space<vmem>>, %arg3: memref<16x128xbf16, #tpu.memory_space<vmem>>, %arg4: memref<64x128xbf16, #tpu.memory_space<vmem>>) attributes {dimension_semantics = [#tpu.dimension_semantics<parallel>, #tpu.dimension_semantics<parallel>], iteration_bounds = array<i64: 2, 1>, scalar_prefetch = 0 : i64, scratch_operands = 0 : i64, tpu.core_type = #tpu.core_type<tc>, window_params = [{transform_indices = @transform_0, window_bounds = array<i64: 64, 16>}, {transform_indices = @transform_1, window_bounds = array<i64: 16, 128>}, {transform_indices = @transform_2, window_bounds = array<i64: 64, 128>}]} {
    %c0 = arith.constant 0 : index
    %c0_0 = arith.constant 0 : index
    %0 = vector.load %arg2[%c0, %c0_0] : memref<64x16xbf16, #tpu.memory_space<vmem>>, vector<64x16xbf16>
    %c0_1 = arith.constant 0 : index
    %c0_2 = arith.constant 0 : index
    %1 = vector.load %arg3[%c0_1, %c0_2] : memref<16x128xbf16, #tpu.memory_space<vmem>>, vector<16x128xbf16>
    %cst = arith.constant dense<0.000000e+00> : vector<64x128xf32>
    %2 = tpu.matmul %0, %1, %cst {dimension_numbers = #tpu.dot_dimension_numbers<[1], [0], [0], [1], [0, 0, 1, 1], [], []>} : vector<64x16xbf16>, vector<16x128xbf16>, vector<64x128xf32> -> vector<64x128xf32>
    %3 = arith.truncf %2 : vector<64x128xf32> to vector<64x128xbf16>
    %c0_3 = arith.constant 0 : index
    %c0_4 = arith.constant 0 : index
    %4 = vector.load %arg4[%c0_3, %c0_4] : memref<64x128xbf16, #tpu.memory_space<vmem>>, vector<64x128xbf16>
    tpu.vector_store %arg4[%c0_3, %c0_4], %3 {strides = array<i32>} : memref<64x128xbf16, #tpu.memory_space<vmem>>, vector<64x128xbf16>,
    return
  }
  func.func @transform_0(%arg0: i32, %arg1: i32) -> (i32, i32) {
    %c0_i32 = arith.constant 0 : i32
    %c0_i32_0 = arith.constant 0 : i32
    return %arg0, %c0_i32 : i32, i32
  }
  func.func @transform_1(%arg0: i32, %arg1: i32) -> (i32, i32) {
    %c0_i32 = arith.constant 0 : i32
    %c0_i32_0 = arith.constant 0 : i32
    return %c0_i32, %arg1 : i32, i32
  }
  func.func @transform_2(%arg0: i32, %arg1: i32) -> (i32, i32) {
    %c0_i32 = arith.constant 0 : i32
    return %arg0, %arg1 : i32, i32
  }
}

module attributes {stable_mosaic.version = 11 : i64} {
  func.func @_matmul_kernel(%arg0: i32, %arg1: i32, %arg2: memref<64x64xbf16, #tpu.memory_space<vmem>>, %arg3: memref<64x32xbf16, #tpu.memory_space<vmem>>, %arg4: memref<64x32xbf16, #tpu.memory_space<vmem>>) attributes {dimension_semantics = [#tpu.dimension_semantics<parallel>, #tpu.dimension_semantics<parallel>], iteration_bounds = array<i64: 2, 1>, scalar_prefetch = 0 : i64, scratch_operands = 0 : i64, tpu.core_type = #tpu.core_type<tc>, window_params = [{transform_indices = @transform_0, window_bounds = array<i64: 64, 64>}, {transform_indices = @transform_1, window_bounds = array<i64: 64, 32>}, {transform_indices = @transform_2, window_bounds = array<i64: 64, 32>}]} {
    %c0 = arith.constant 0 : index
    %c0_0 = arith.constant 0 : index
    %0 = vector.load %arg2[%c0, %c0_0] : memref<64x64xbf16, #tpu.memory_space<vmem>>, vector<64x64xbf16>
    %c0_1 = arith.constant 0 : index
    %c0_2 = arith.constant 0 : index
    %1 = vector.load %arg3[%c0_1, %c0_2] : memref<64x32xbf16, #tpu.memory_space<vmem>>, vector<64x32xbf16>
    %cst = arith.constant dense<0.000000e+00> : vector<64x32xf32>
    %2 = tpu.matmul %0, %1, %cst {dimension_numbers = #tpu.dot_dimension_numbers<[1], [0], [0], [1], [0, 0, 1, 1], [], []>} : vector<64x64xbf16>, vector<64x32xbf16>, vector<64x32xf32> -> vector<64x32xf32>
    %3 = arith.truncf %2 : vector<64x32xf32> to vector<64x32xbf16>
    %c0_3 = arith.constant 0 : index
    %c0_4 = arith.constant 0 : index
    %4 = vector.load %arg4[%c0_3, %c0_4] : memref<64x32xbf16, #tpu.memory_space<vmem>>, vector<64x32xbf16>
    tpu.vector_store %arg4[%c0_3, %c0_4], %3 {strides = array<i32>} : memref<64x32xbf16, #tpu.memory_space<vmem>>, vector<64x32xbf16>,
    return
  }
  func.func @transform_0(%arg0: i32, %arg1: i32) -> (i32, i32) {
    %c0_i32 = arith.constant 0 : i32
    %c0_i32_0 = arith.constant 0 : i32
    return %arg0, %c0_i32 : i32, i32
  }
  func.func @transform_1(%arg0: i32, %arg1: i32) -> (i32, i32) {
    %c0_i32 = arith.constant 0 : i32
    %c0_i32_0 = arith.constant 0 : i32
    return %c0_i32, %arg1 : i32, i32
  }
  func.func @transform_2(%arg0: i32, %arg1: i32) -> (i32, i32) {
    %c0_i32 = arith.constant 0 : i32
    return %arg0, %arg1 : i32, i32
  }
}

module attributes {stable_mosaic.version = 11 : i64} {
  func.func @_adj_builder_kernel(%arg0: i32, %arg1: i32, %arg2: memref<4x128xi32, #tpu.memory_space<vmem>>, %arg3: memref<64x16xbf16, #tpu.memory_space<vmem>>, %arg4: memref<16x128xbf16, #tpu.memory_space<vmem>>, %arg5: memref<1x128xf32, #tpu.memory_space<vmem>>, %arg6: memref<64x1xf32, #tpu.memory_space<vmem>>, %arg7: memref<64x128xf32, #tpu.memory_space<vmem>>, %arg8: memref<2x64x128xbf16, #tpu.memory_space<vmem>>) attributes {dimension_semantics = [#tpu.dimension_semantics<parallel>, #tpu.dimension_semantics<parallel>], iteration_bounds = array<i64: 2, 1>, scalar_prefetch = 0 : i64, scratch_operands = 0 : i64, tpu.core_type = #tpu.core_type<tc>, window_params = [{transform_indices = @transform_0, window_bounds = array<i64: 4, 128>}, {transform_indices = @transform_1, window_bounds = array<i64: 64, 16>}, {transform_indices = @transform_2, window_bounds = array<i64: 16, 128>}, {transform_indices = @transform_3, window_bounds = array<i64: 1, 128>}, {transform_indices = @transform_4, window_bounds = array<i64: 64, 1>}, {transform_indices = @transform_5, window_bounds = array<i64: 64, 128>}, {transform_indices = @transform_6, window_bounds = array<i64: 2, 64, 128>}]} {
    %c64_i32 = arith.constant 64 : i32
    %0 = arith.muli %arg0, %c64_i32 : i32
    %c128_i32 = arith.constant 128 : i32
    %1 = arith.muli %arg1, %c128_i32 : i32
    %2 = tpu.iota {dimensions = array<i32: 0>} : vector<64x1xi32>
    %3 = vector.broadcast %0 : i32 to vector<64x1xi32>
    %4 = arith.addi %2, %3 : vector<64x1xi32>
    %5 = tpu.iota {dimensions = array<i32: 1>} : vector<64x128xi32>
    %6 = vector.broadcast %1 : i32 to vector<64x128xi32>
    %7 = arith.addi %5, %6 : vector<64x128xi32>
    %8 = vector.broadcast %4 : vector<64x1xi32> to vector<64x128xi32>
    %9 = arith.cmpi eq, %7, %8 : vector<64x128xi32>
    %10 = arith.extui %9 : vector<64x128xi1> to vector<64x128xi32>
    %11 = arith.sitofp %10 : vector<64x128xi32> to vector<64x128xf32>
    %c0 = arith.constant 0 : index
    %c0_0 = arith.constant 0 : index
    %12 = vector.load %arg2[%c0, %c0_0] : memref<4x128xi32, #tpu.memory_space<vmem>>, vector<1x128xi32>
    %13 = vector.broadcast %12 : vector<1x128xi32> to vector<64x128xi32>
    %14 = vector.broadcast %4 : vector<64x1xi32> to vector<64x128xi32>
    %15 = arith.cmpi eq, %13, %14 : vector<64x128xi32>
    %16 = arith.extui %15 : vector<64x128xi1> to vector<64x128xi32>
    %17 = arith.sitofp %16 : vector<64x128xi32> to vector<64x128xf32>
    %18 = arith.addf %11, %17 : vector<64x128xf32>
    %c1 = arith.constant 1 : index
    %c0_1 = arith.constant 0 : index
    %19 = vector.load %arg2[%c1, %c0_1] : memref<4x128xi32, #tpu.memory_space<vmem>>, vector<1x128xi32>
    %20 = vector.broadcast %19 : vector<1x128xi32> to vector<64x128xi32>
    %21 = vector.broadcast %4 : vector<64x1xi32> to vector<64x128xi32>
    %22 = arith.cmpi eq, %20, %21 : vector<64x128xi32>
    %23 = arith.extui %22 : vector<64x128xi1> to vector<64x128xi32>
    %24 = arith.sitofp %23 : vector<64x128xi32> to vector<64x128xf32>
    %25 = arith.addf %18, %24 : vector<64x128xf32>
    %c2 = arith.constant 2 : index
    %c0_2 = arith.constant 0 : index
    %26 = vector.load %arg2[%c2, %c0_2] : memref<4x128xi32, #tpu.memory_space<vmem>>, vector<1x128xi32>
    %27 = vector.broadcast %26 : vector<1x128xi32> to vector<64x128xi32>
    %28 = vector.broadcast %4 : vector<64x1xi32> to vector<64x128xi32>
    %29 = arith.cmpi eq, %27, %28 : vector<64x128xi32>
    %30 = arith.extui %29 : vector<64x128xi1> to vector<64x128xi32>
    %31 = arith.sitofp %30 : vector<64x128xi32> to vector<64x128xf32>
    %32 = arith.addf %25, %31 : vector<64x128xf32>
    %c3 = arith.constant 3 : index
    %c0_3 = arith.constant 0 : index
    %33 = vector.load %arg2[%c3, %c0_3] : memref<4x128xi32, #tpu.memory_space<vmem>>, vector<1x128xi32>
    %34 = vector.broadcast %33 : vector<1x128xi32> to vector<64x128xi32>
    %35 = vector.broadcast %4 : vector<64x1xi32> to vector<64x128xi32>
    %36 = arith.cmpi eq, %34, %35 : vector<64x128xi32>
    %37 = arith.extui %36 : vector<64x128xi1> to vector<64x128xi32>
    %38 = arith.sitofp %37 : vector<64x128xi32> to vector<64x128xf32>
    %39 = arith.addf %32, %38 : vector<64x128xf32>
    %c0_4 = arith.constant 0 : index
    %c0_5 = arith.constant 0 : index
    %40 = vector.load %arg3[%c0_4, %c0_5] : memref<64x16xbf16, #tpu.memory_space<vmem>>, vector<64x16xbf16>
    %c0_6 = arith.constant 0 : index
    %c0_7 = arith.constant 0 : index
    %41 = vector.load %arg4[%c0_6, %c0_7] : memref<16x128xbf16, #tpu.memory_space<vmem>>, vector<16x128xbf16>
    %cst = arith.constant dense<0.000000e+00> : vector<64x128xf32>
    %42 = tpu.matmul %40, %41, %cst {dimension_numbers = #tpu.dot_dimension_numbers<[1], [0], [0], [1], [0, 0, 1, 1], [], []>} : vector<64x16xbf16>, vector<16x128xbf16>, vector<64x128xf32> -> vector<64x128xf32>
    %43 = arith.mulf %39, %42 : vector<64x128xf32>
    %c0_8 = arith.constant 0 : index
    %c0_9 = arith.constant 0 : index
    %44 = vector.load %arg5[%c0_8, %c0_9] : memref<1x128xf32, #tpu.memory_space<vmem>>, vector<1x128xf32>
    %45 = vector.broadcast %44 : vector<1x128xf32> to vector<64x128xf32>
    %46 = arith.mulf %43, %45 : vector<64x128xf32>
    %c0_10 = arith.constant 0 : index
    %c0_11 = arith.constant 0 : index
    %47 = vector.load %arg6[%c0_10, %c0_11] : memref<64x1xf32, #tpu.memory_space<vmem>>, vector<64x1xf32>
    %48 = vector.broadcast %47 : vector<64x1xf32> to vector<64x128xf32>
    %49 = arith.mulf %46, %48 : vector<64x128xf32>
    %c0_12 = arith.constant 0 : index
    %c0_13 = arith.constant 0 : index
    %50 = vector.load %arg7[%c0_12, %c0_13] : memref<64x128xf32, #tpu.memory_space<vmem>>, vector<64x128xf32>
    %51 = arith.truncf %50 : vector<64x128xf32> to vector<64x128xbf16>
    %c0_14 = arith.constant 0 : index
    %c0_15 = arith.constant 0 : index
    %c0_16 = arith.constant 0 : index
    %52 = vector.load %arg8[%c0_14, %c0_15, %c0_16] : memref<2x64x128xbf16, #tpu.memory_space<vmem>>, vector<1x64x128xbf16>
    %53 = vector.shape_cast %52 : vector<1x64x128xbf16> to vector<64x128xbf16>
    %54 = vector.shape_cast %51 : vector<64x128xbf16> to vector<1x64x128xbf16>
    tpu.vector_store %arg8[%c0_14, %c0_15, %c0_16], %54 {strides = array<i32>} : memref<2x64x128xbf16, #tpu.memory_space<vmem>>, vector<1x64x128xbf16>,
    %55 = arith.truncf %49 : vector<64x128xf32> to vector<64x128xbf16>
    %c1_17 = arith.constant 1 : index
    %c0_18 = arith.constant 0 : index
    %c0_19 = arith.constant 0 : index
    %56 = vector.load %arg8[%c1_17, %c0_18, %c0_19] : memref<2x64x128xbf16, #tpu.memory_space<vmem>>, vector<1x64x128xbf16>
    %57 = vector.shape_cast %56 : vector<1x64x128xbf16> to vector<64x128xbf16>
    %58 = vector.shape_cast %55 : vector<64x128xbf16> to vector<1x64x128xbf16>
    tpu.vector_store %arg8[%c1_17, %c0_18, %c0_19], %58 {strides = array<i32>} : memref<2x64x128xbf16, #tpu.memory_space<vmem>>, vector<1x64x128xbf16>,
    return
  }
  func.func @transform_0(%arg0: i32, %arg1: i32) -> (i32, i32) {
    %c0_i32 = arith.constant 0 : i32
    %c0_i32_0 = arith.constant 0 : i32
    return %c0_i32, %arg1 : i32, i32
  }
  func.func @transform_1(%arg0: i32, %arg1: i32) -> (i32, i32) {
    %c0_i32 = arith.constant 0 : i32
    %c0_i32_0 = arith.constant 0 : i32
    return %arg0, %c0_i32 : i32, i32
  }
  func.func @transform_2(%arg0: i32, %arg1: i32) -> (i32, i32) {
    %c0_i32 = arith.constant 0 : i32
    %c0_i32_0 = arith.constant 0 : i32
    return %c0_i32, %arg1 : i32, i32
  }
  func.func @transform_3(%arg0: i32, %arg1: i32) -> (i32, i32) {
    %c0_i32 = arith.constant 0 : i32
    %c0_i32_0 = arith.constant 0 : i32
    return %c0_i32, %arg1 : i32, i32
  }
  func.func @transform_4(%arg0: i32, %arg1: i32) -> (i32, i32) {
    %c0_i32 = arith.constant 0 : i32
    %c0_i32_0 = arith.constant 0 : i32
    return %arg0, %c0_i32 : i32, i32
  }
  func.func @transform_5(%arg0: i32, %arg1: i32) -> (i32, i32) {
    %c0_i32 = arith.constant 0 : i32
    return %arg0, %arg1 : i32, i32
  }
  func.func @transform_6(%arg0: i32, %arg1: i32) -> (i32, i32, i32) {
    %c0_i32 = arith.constant 0 : i32
    %c0_i32_0 = arith.constant 0 : i32
    return %c0_i32, %arg0, %arg1 : i32, i32, i32
  }
}

module attributes {stable_mosaic.version = 11 : i64} {
  func.func @_gcn_layer1_kernel(%arg0: i32, %arg1: i32, %arg2: i32, %arg3: memref<1x64x128xbf16, #tpu.memory_space<vmem>>, %arg4: memref<128x32xbf16, #tpu.memory_space<vmem>>, %arg5: memref<1x32xf32, #tpu.memory_space<vmem>>, %arg6: memref<32x8xbf16, #tpu.memory_space<vmem>>, %arg7: memref<1x64x8xbf16, #tpu.memory_space<vmem>>, %arg8: memref<64x32xf32, #tpu.memory_space<vmem>>) attributes {dimension_semantics = [#tpu.dimension_semantics<parallel>, #tpu.dimension_semantics<parallel>, #tpu.dimension_semantics<arbitrary>], iteration_bounds = array<i64: 2, 2, 1>, scalar_prefetch = 0 : i64, scratch_operands = 1 : i64, tpu.core_type = #tpu.core_type<tc>, window_params = [{transform_indices = @transform_0, window_bounds = array<i64: 1, 64, 128>}, {transform_indices = @transform_1, window_bounds = array<i64: 128, 32>}, {pipeline_mode = #tpu.pipeline_mode<synchronous>, transform_indices = @transform_2, window_bounds = array<i64: 1, 32>}, {pipeline_mode = #tpu.pipeline_mode<synchronous>, transform_indices = @transform_3, window_bounds = array<i64: 32, 8>}, {transform_indices = @transform_4, window_bounds = array<i64: 1, 64, 8>}]} {
    %c0_i32 = arith.constant 0 : i32
    %0 = arith.cmpi eq, %arg2, %c0_i32 : i32
    %1 = arith.extui %0 : i1 to i32
    %c0_i32_0 = arith.constant 0 : i32
    %2 = arith.cmpi ne, %1, %c0_i32_0 : i32
    scf.if %2 {
      %cst_11 = arith.constant 0.000000e+00 : f32
      %13 = vector.broadcast %cst_11 : f32 to vector<64x32xf32>
      %c0_12 = arith.constant 0 : index
      %c0_13 = arith.constant 0 : index
      %14 = vector.load %arg8[%c0_12, %c0_13] : memref<64x32xf32, #tpu.memory_space<vmem>>, vector<64x32xf32>
      tpu.vector_store %arg8[%c0_12, %c0_13], %13 {strides = array<i32>} : memref<64x32xf32, #tpu.memory_space<vmem>>, vector<64x32xf32>,
    } else {
    }
    %c0 = arith.constant 0 : index
    %c0_1 = arith.constant 0 : index
    %3 = vector.load %arg8[%c0, %c0_1] : memref<64x32xf32, #tpu.memory_space<vmem>>, vector<64x32xf32>
    %c0_2 = arith.constant 0 : index
    %c0_3 = arith.constant 0 : index
    %c0_4 = arith.constant 0 : index
    %4 = vector.load %arg3[%c0_2, %c0_3, %c0_4] : memref<1x64x128xbf16, #tpu.memory_space<vmem>>, vector<1x64x128xbf16>
    %5 = vector.shape_cast %4 : vector<1x64x128xbf16> to vector<64x128xbf16>
    %c0_5 = arith.constant 0 : index
    %c0_6 = arith.constant 0 : index
    %6 = vector.load %arg4[%c0_5, %c0_6] : memref<128x32xbf16, #tpu.memory_space<vmem>>, vector<128x32xbf16>
    %cst = arith.constant dense<0.000000e+00> : vector<64x32xf32>
    %7 = tpu.matmul %5, %6, %cst {dimension_numbers = #tpu.dot_dimension_numbers<[1], [0], [0], [1], [0, 0, 1, 1], [], []>} : vector<64x128xbf16>, vector<128x32xbf16>, vector<64x32xf32> -> vector<64x32xf32>
    %8 = arith.addf %3, %7 : vector<64x32xf32>
    %c0_7 = arith.constant 0 : index
    %c0_8 = arith.constant 0 : index
    %9 = vector.load %arg8[%c0_7, %c0_8] : memref<64x32xf32, #tpu.memory_space<vmem>>, vector<64x32xf32>
    tpu.vector_store %arg8[%c0_7, %c0_8], %8 {strides = array<i32>} : memref<64x32xf32, #tpu.memory_space<vmem>>, vector<64x32xf32>,
    %c0_i32_9 = arith.constant 0 : i32
    %10 = arith.cmpi eq, %arg2, %c0_i32_9 : i32
    %11 = arith.extui %10 : i1 to i32
    %c0_i32_10 = arith.constant 0 : i32
    %12 = arith.cmpi ne, %11, %c0_i32_10 : i32
    scf.if %12 {
      %c0_11 = arith.constant 0 : index
      %c0_12 = arith.constant 0 : index
      %13 = vector.load %arg8[%c0_11, %c0_12] : memref<64x32xf32, #tpu.memory_space<vmem>>, vector<64x32xf32>
      %c0_13 = arith.constant 0 : index
      %c0_14 = arith.constant 0 : index
      %14 = vector.load %arg5[%c0_13, %c0_14] : memref<1x32xf32, #tpu.memory_space<vmem>>, vector<1x32xf32>
      %15 = vector.broadcast %14 : vector<1x32xf32> to vector<64x32xf32>
      %16 = arith.addf %13, %15 : vector<64x32xf32>
      %cst_15 = arith.constant 0.000000e+00 : f32
      %17 = vector.broadcast %cst_15 : f32 to vector<64x32xf32>
      %18 = arith.maximumf %16, %17 : vector<64x32xf32>
      %19 = arith.truncf %18 : vector<64x32xf32> to vector<64x32xbf16>
      %c0_16 = arith.constant 0 : index
      %c0_17 = arith.constant 0 : index
      %20 = vector.load %arg6[%c0_16, %c0_17] : memref<32x8xbf16, #tpu.memory_space<vmem>>, vector<32x8xbf16>
      %cst_18 = arith.constant dense<0.000000e+00> : vector<64x8xf32>
      %21 = tpu.matmul %19, %20, %cst_18 {dimension_numbers = #tpu.dot_dimension_numbers<[1], [0], [0], [1], [0, 0, 1, 1], [], []>} : vector<64x32xbf16>, vector<32x8xbf16>, vector<64x8xf32> -> vector<64x8xf32>
      %22 = arith.truncf %21 : vector<64x8xf32> to vector<64x8xbf16>
      %c0_19 = arith.constant 0 : index
      %c0_20 = arith.constant 0 : index
      %c0_21 = arith.constant 0 : index
      %23 = vector.load %arg7[%c0_19, %c0_20, %c0_21] : memref<1x64x8xbf16, #tpu.memory_space<vmem>>, vector<1x64x8xbf16>
      %24 = vector.shape_cast %23 : vector<1x64x8xbf16> to vector<64x8xbf16>
      %25 = vector.shape_cast %22 : vector<64x8xbf16> to vector<1x64x8xbf16>
      tpu.vector_store %arg7[%c0_19, %c0_20, %c0_21], %25 {strides = array<i32>} : memref<1x64x8xbf16, #tpu.memory_space<vmem>>, vector<1x64x8xbf16>,
    } else {
    }
    return
  }
  func.func @transform_0(%arg0: i32, %arg1: i32, %arg2: i32) -> (i32, i32, i32) {
    %c0_i32 = arith.constant 0 : i32
    return %arg0, %arg1, %arg2 : i32, i32, i32
  }
  func.func @transform_1(%arg0: i32, %arg1: i32, %arg2: i32) -> (i32, i32) {
    %c0_i32 = arith.constant 0 : i32
    %c0_i32_0 = arith.constant 0 : i32
    return %arg2, %c0_i32 : i32, i32
  }
  func.func @transform_2(%arg0: i32, %arg1: i32, %arg2: i32) -> (i32, i32) {
    %c0_i32 = arith.constant 0 : i32
    %c0_i32_0 = arith.constant 0 : i32
    %c0_i32_1 = arith.constant 0 : i32
    return %c0_i32, %c0_i32_0 : i32, i32
  }
  func.func @transform_3(%arg0: i32, %arg1: i32, %arg2: i32) -> (i32, i32) {
    %c0_i32 = arith.constant 0 : i32
    %c0_i32_0 = arith.constant 0 : i32
    %c0_i32_1 = arith.constant 0 : i32
    return %c0_i32, %c0_i32_0 : i32, i32
  }
  func.func @transform_4(%arg0: i32, %arg1: i32, %arg2: i32) -> (i32, i32, i32) {
    %c0_i32 = arith.constant 0 : i32
    %c0_i32_0 = arith.constant 0 : i32
    return %arg0, %arg1, %c0_i32 : i32, i32, i32
  }
}

module attributes {stable_mosaic.version = 11 : i64} {
  func.func @_gcn_layer2_kernel(%arg0: i32, %arg1: i32, %arg2: i32, %arg3: memref<1x64x128xbf16, #tpu.memory_space<vmem>>, %arg4: memref<1x128x8xbf16, #tpu.memory_space<vmem>>, %arg5: memref<1x8xf32, #tpu.memory_space<vmem>>, %arg6: memref<1x64x8xf32, #tpu.memory_space<vmem>>, %arg7: memref<64x8xf32, #tpu.memory_space<vmem>>) attributes {dimension_semantics = [#tpu.dimension_semantics<parallel>, #tpu.dimension_semantics<parallel>, #tpu.dimension_semantics<arbitrary>], iteration_bounds = array<i64: 2, 2, 1>, scalar_prefetch = 0 : i64, scratch_operands = 1 : i64, tpu.core_type = #tpu.core_type<tc>, window_params = [{transform_indices = @transform_0, window_bounds = array<i64: 1, 64, 128>}, {transform_indices = @transform_1, window_bounds = array<i64: 1, 128, 8>}, {pipeline_mode = #tpu.pipeline_mode<synchronous>, transform_indices = @transform_2, window_bounds = array<i64: 1, 8>}, {transform_indices = @transform_3, window_bounds = array<i64: 1, 64, 8>}]} {
    %c0_i32 = arith.constant 0 : i32
    %0 = arith.cmpi eq, %arg2, %c0_i32 : i32
    %1 = arith.extui %0 : i1 to i32
    %c0_i32_0 = arith.constant 0 : i32
    %2 = arith.cmpi ne, %1, %c0_i32_0 : i32
    scf.if %2 {
      %cst_12 = arith.constant 0.000000e+00 : f32
      %14 = vector.broadcast %cst_12 : f32 to vector<64x8xf32>
      %c0_13 = arith.constant 0 : index
      %c0_14 = arith.constant 0 : index
      %15 = vector.load %arg7[%c0_13, %c0_14] : memref<64x8xf32, #tpu.memory_space<vmem>>, vector<64x8xf32>
      tpu.vector_store %arg7[%c0_13, %c0_14], %14 {strides = array<i32>} : memref<64x8xf32, #tpu.memory_space<vmem>>, vector<64x8xf32>,
    } else {
    }
    %c0 = arith.constant 0 : index
    %c0_1 = arith.constant 0 : index
    %3 = vector.load %arg7[%c0, %c0_1] : memref<64x8xf32, #tpu.memory_space<vmem>>, vector<64x8xf32>
    %c0_2 = arith.constant 0 : index
    %c0_3 = arith.constant 0 : index
    %c0_4 = arith.constant 0 : index
    %4 = vector.load %arg3[%c0_2, %c0_3, %c0_4] : memref<1x64x128xbf16, #tpu.memory_space<vmem>>, vector<1x64x128xbf16>
    %5 = vector.shape_cast %4 : vector<1x64x128xbf16> to vector<64x128xbf16>
    %c0_5 = arith.constant 0 : index
    %c0_6 = arith.constant 0 : index
    %c0_7 = arith.constant 0 : index
    %6 = vector.load %arg4[%c0_5, %c0_6, %c0_7] : memref<1x128x8xbf16, #tpu.memory_space<vmem>>, vector<1x128x8xbf16>
    %7 = vector.shape_cast %6 : vector<1x128x8xbf16> to vector<128x8xbf16>
    %cst = arith.constant dense<0.000000e+00> : vector<64x8xf32>
    %8 = tpu.matmul %5, %7, %cst {dimension_numbers = #tpu.dot_dimension_numbers<[1], [0], [0], [1], [0, 0, 1, 1], [], []>} : vector<64x128xbf16>, vector<128x8xbf16>, vector<64x8xf32> -> vector<64x8xf32>
    %9 = arith.addf %3, %8 : vector<64x8xf32>
    %c0_8 = arith.constant 0 : index
    %c0_9 = arith.constant 0 : index
    %10 = vector.load %arg7[%c0_8, %c0_9] : memref<64x8xf32, #tpu.memory_space<vmem>>, vector<64x8xf32>
    tpu.vector_store %arg7[%c0_8, %c0_9], %9 {strides = array<i32>} : memref<64x8xf32, #tpu.memory_space<vmem>>, vector<64x8xf32>,
    %c0_i32_10 = arith.constant 0 : i32
    %11 = arith.cmpi eq, %arg2, %c0_i32_10 : i32
    %12 = arith.extui %11 : i1 to i32
    %c0_i32_11 = arith.constant 0 : i32
    %13 = arith.cmpi ne, %12, %c0_i32_11 : i32
    scf.if %13 {
      %c0_12 = arith.constant 0 : index
      %c0_13 = arith.constant 0 : index
      %14 = vector.load %arg7[%c0_12, %c0_13] : memref<64x8xf32, #tpu.memory_space<vmem>>, vector<64x8xf32>
      %c0_14 = arith.constant 0 : index
      %c0_15 = arith.constant 0 : index
      %15 = vector.load %arg5[%c0_14, %c0_15] : memref<1x8xf32, #tpu.memory_space<vmem>>, vector<1x8xf32>
      %16 = vector.broadcast %15 : vector<1x8xf32> to vector<64x8xf32>
      %17 = arith.addf %14, %16 : vector<64x8xf32>
      %18 = arith.mulf %17, %17 : vector<64x8xf32>
      %cst_16 = arith.constant dense<0.000000e+00> : vector<64xf32>
      %19 = vector.multi_reduction <add>, %18, %cst_16 [1] : vector<64x8xf32> to vector<64xf32>
      %20 = vector.shape_cast %19 : vector<64xf32> to vector<64x1xf32>
      %cst_17 = arith.constant 1.000000e-24 : f32
      %21 = vector.broadcast %cst_17 : f32 to vector<64x1xf32>
      %22 = arith.maximumf %20, %21 : vector<64x1xf32>
      %23 = math.rsqrt %22 : vector<64x1xf32>
      %24 = vector.broadcast %23 : vector<64x1xf32> to vector<64x8xf32>
      %25 = arith.mulf %17, %24 : vector<64x8xf32>
      %c0_18 = arith.constant 0 : index
      %c0_19 = arith.constant 0 : index
      %c0_20 = arith.constant 0 : index
      %26 = vector.load %arg6[%c0_18, %c0_19, %c0_20] : memref<1x64x8xf32, #tpu.memory_space<vmem>>, vector<1x64x8xf32>
      %27 = vector.shape_cast %26 : vector<1x64x8xf32> to vector<64x8xf32>
      %28 = vector.shape_cast %25 : vector<64x8xf32> to vector<1x64x8xf32>
      tpu.vector_store %arg6[%c0_18, %c0_19, %c0_20], %28 {strides = array<i32>} : memref<1x64x8xf32, #tpu.memory_space<vmem>>, vector<1x64x8xf32>,
    } else {
    }
    return
  }
  func.func @transform_0(%arg0: i32, %arg1: i32, %arg2: i32) -> (i32, i32, i32) {
    %c0_i32 = arith.constant 0 : i32
    return %arg0, %arg1, %arg2 : i32, i32, i32
  }
  func.func @transform_1(%arg0: i32, %arg1: i32, %arg2: i32) -> (i32, i32, i32) {
    %c0_i32 = arith.constant 0 : i32
    %c0_i32_0 = arith.constant 0 : i32
    return %arg0, %arg2, %c0_i32 : i32, i32, i32
  }
  func.func @transform_2(%arg0: i32, %arg1: i32, %arg2: i32) -> (i32, i32) {
    %c0_i32 = arith.constant 0 : i32
    %c0_i32_0 = arith.constant 0 : i32
    %c0_i32_1 = arith.constant 0 : i32
    return %c0_i32, %c0_i32_0 : i32, i32
  }
  func.func @transform_3(%arg0: i32, %arg1: i32, %arg2: i32) -> (i32, i32, i32) {
    %c0_i32 = arith.constant 0 : i32
    %c0_i32_0 = arith.constant 0 : i32
    return %arg0, %arg1, %c0_i32 : i32, i32, i32
  }
}

</mosaic_0001>

<bundles_post_ra>
// kernel: mgsl_kge_forward.5
= control target key start
LH: loop header
LB: loop body
LE: loop exit
PB: predicated region body
PF: predicated region fallthrough
CT: control target
= control target key end

     0   :  { %s574_s9 = smov 0   ;;  %s576_s10 = smov 0   ;;  %s610_s0 = inlined_call_operand.vmem [shape: bf16[128,16], index: 0, kind: input, shape index: {}]   ;;  %s611_s1 = inlined_call_operand.vmem [shape: bf16[16,128], index: 1, kind: input, shape index: {}]   ;;  %s612_s2 = inlined_call_operand.vmem [shape: bf16[128,128], index: 2, kind: output, shape index: {}]  }
   0x1   :  { %s578_s11 = smov 0  }
   0x2 LB: > { %s24_s12 = sadd.s32 1, %s553_s10  ;;  %p434_p0 = scmp.ge.s32.totalorder %s557_s11, 1  ;;  %s557_s11 = sphi %s578_s11, %s12_s11   ;;  %s553_s10 = sphi %s576_s10, %s614_s10   ;;  %s549_s9 = sphi %s574_s9, %s613_s9  }
   0x3   : > { %p26_p1 = scmp.ge.s32.totalorder %s24_s12, 2  ;;  %p136_p2 = scmp.lt.s32.totalorder %s557_s11, 3 }
   0x5   : > { %s616_s12 = smov (%p26_p1, %s24_s12), 0  ;;  %p137_p3 = pnand %p434_p0, %p136_p2 }
   0x6   : > { %v530_v0 = vld [vmem:[%s611_s1] sm:$0xff] (!%p137_p3)   ;;  %s435_s15 = sshll.u32 (!%p137_p3), %s549_s9, 3  ;;  %vm221_vm0 = vcmask (!%p137_p3), 130048  }
   0x7   : > { %140 = sbr.rel (%p137_p3) target bundleno = 237 (0xed), region = 28  ;;  %p166_p4 = scmp.lt.s32.totalorder (!%p137_p3), %s435_s15, 15  ;;  %494 = vmatprep.subr.bf16.mxu0 (!%p137_p3), %v530_v0  ;;  %504 = vmatprep.subr.bf16.mxu1 (!%p137_p3), %v530_v0 }
   0x8   : > { %495 = vmatpush3.bf16.msra.mxu0 (!%p137_p3), %v530_v0  ;;  %505 = vmatpush3.bf16.msra.mxu1 (!%p137_p3), %v530_v0 }
   0xe   : > { %s618_s15 = smov (!%p166_p4, %s435_s15), 15 }
   0xf   : > { %s436_s16 = sshll.u32 %s618_s15, 2 }
  0x10   : > { %s169_s19 = scalar_lea.vmem %s610_s0, %s436_s16  ;;  %s182_s22 = scalar_lea.vmem %s612_s2, %s436_s16 }
  0x11   : > { %v531_v1 = vld [vmem:[%s169_s19] sm:$0xff]   ;;  %v532_v2 = vld [vmem:[%s169_s19 + $0x10] sm:$0xff]   ;;  %v533_v3 = vld [vmem:[%s169_s19 + $0x8] sm:$0xff]  }
  0x12   : > { %496 = vmatprep.mubr.msk.bf16.mxu0 %vm221_vm0, %v531_v1  ;;  %500 = vmatprep.mubr.msk.bf16.mxu1 %vm221_vm0, %v532_v2  ;;  %v534_v4 = vld [vmem:[%s169_s19 + $0x18] sm:$0xff]  }
  0x13   : > { %497 = vmatmul.mubr.msk.bf16.vlgmr.msra.gmra.mrb[0].mxu0 %vm221_vm0, %v533_v3  ;;  %501 = vmatmul.mubr.msk.bf16.vlgmr.msra.gmra.mrb[0].mxu1 %vm221_vm0, %v534_v4 }
  0xe6   : > { %v498_v5 = vpop.f32.mrb[0].mxu0  ;;  %v502_v6 = vpop.f32.mrb[0].mxu1 }
  0xe7   : > { %v268_v7 = vpop.f32.mrb[1].mxu0  ;;  %v284_v8 = vpop.f32.mrb[1].mxu1 }
  0xe8   : > { %v499_v9 = vpop.f32.mrb[2].mxu0  ;;  %v503_v11 = vpop.f32.mrb[2].mxu1 }
  0xe9   : > { %v474_v10 = vpack.c.bf16 %v499_v9, %v498_v5  ;;  %v271_v12 = vpop.f32.mrb[3].mxu0  ;;  %v484_v13 = vpack.c.bf16 %v503_v11, %v502_v6  ;;  %v287_v15 = vpop.f32.mrb[3].mxu1 }
  0xea   : > { %v469_v14 = vpack.c.bf16 %v271_v12, %v268_v7  ;;  %v479_v16 = vpack.c.bf16 %v287_v15, %v284_v8 }
  0xeb   : > { %486 = vst [vmem:[%s182_s22 + $0x8] sm:$0xff] %v474_v10   ;;  %488 = vst [vmem:[%s182_s22 + $0x18] sm:$0xff] %v484_v13  }
  0xec   : > { %470 = vst [vmem:[%s182_s22] sm:$0xff] %v469_v14   ;;  %487 = vst [vmem:[%s182_s22 + $0x10] sm:$0xff] %v479_v16  }
  0xed PF: > { %s12_s11 = sadd.s32 1, %s557_s11   ;;  %s613_s9 = smov %s553_s10 }
  0xee   : > { %p9_p5 = scmp.ge.s32.totalorder %s12_s11, 4   ;;  %s614_s10 = smov %s616_s12 }
  0xf0   :  { %11 = sbr.rel (!%p9_p5) target bundleno = 2 (0x2), region = 61 }

// kernel: mgsl_kge_forward.7
= control target key start
LH: loop header
LB: loop body
LE: loop exit
PB: predicated region body
PF: predicated region fallthrough
CT: control target
= control target key end

     0   :  { %s597_s9 = smov 0   ;;  %s599_s10 = smov 0   ;;  %s654_s0 = inlined_call_operand.vmem [shape: bf16[128,64], index: 0, kind: input, shape index: {}]   ;;  %s655_s1 = inlined_call_operand.vmem [shape: bf16[64,32], index: 1, kind: input, shape index: {}]   ;;  %s656_s2 = inlined_call_operand.vmem [shape: bf16[128,32], index: 2, kind: output, shape index: {}]  }
   0x1   :  { %s601_s11 = smov 0  }
   0x2 LB: > { %s24_s12 = sadd.s32 1, %s576_s10  ;;  %p459_p0 = scmp.ge.s32.totalorder %s580_s11, 1  ;;  %s580_s11 = sphi %s601_s11, %s12_s11   ;;  %s576_s10 = sphi %s599_s10, %s658_s10   ;;  %s572_s9 = sphi %s597_s9, %s657_s9  }
   0x3   : > { %p26_p1 = scmp.ge.s32.totalorder %s24_s12, 2  ;;  %p136_p2 = scmp.lt.s32.totalorder %s580_s11, 3 }
   0x5   : > { %s660_s12 = smov (%p26_p1, %s24_s12), 0  ;;  %p137_p3 = pnand %p459_p0, %p136_p2 }
   0x6   : > { %v550_v0 = vld [vmem:[%s655_s1] sm:$0xff] (!%p137_p3)   ;;  %s460_s15 = sshll.u32 (!%p137_p3), %s572_s9, 3  ;;  %v551_v1 = vld [vmem:[%s655_s1 + $0x8] sm:$0xff] (!%p137_p3)   ;;  %v552_v2 = vld [vmem:[%s655_s1 + $0x10] sm:$0xff] (!%p137_p3)   ;;  %vm245_vm0 = vcmask (!%p137_p3), 523264   ;;  %vm355_vm1 = vcmask (!%p137_p3), 257024  }
   0x7   : > { %140 = sbr.rel (%p137_p3) target bundleno = 241 (0xf1), region = 28  ;;  %p166_p4 = scmp.lt.s32.totalorder (!%p137_p3), %s460_s15, 15  ;;  %502 = vmatprep.subr.bf16.mxu0 (!%p137_p3), %v550_v0  ;;  %518 = vmatprep.subr.bf16.mxu1 (!%p137_p3), %v550_v0  ;;  %v553_v3 = vld [vmem:[%s655_s1 + $0x18] sm:$0xff] (!%p137_p3)  }
   0x8   : > { %503 = vmatpush3.bf16.msra.mxu0 (!%p137_p3), %v550_v0  ;;  %522 = vmatpush3.bf16.msra.mxu1 (!%p137_p3), %v550_v0 }
   0x9   : > { %504 = vmatprep.subr.bf16.mxu0 (!%p137_p3), %v551_v1  ;;  %519 = vmatprep.subr.bf16.mxu1 (!%p137_p3), %v551_v1 }
   0xc   : > { %505 = vmatpush3.bf16.msra.mxu0 (!%p137_p3), %v551_v1  ;;  %523 = vmatpush3.bf16.msra.mxu1 (!%p137_p3), %v551_v1 }
   0xd   : > { %506 = vmatprep.subr.bf16.mxu0 (!%p137_p3), %v552_v2  ;;  %520 = vmatprep.subr.bf16.mxu1 (!%p137_p3), %v552_v2 }
   0xe   : > { %s662_s15 = smov (!%p166_p4, %s460_s15), 15 }
   0xf   : > { %s461_s20 = sshll.u32 %s662_s15, 2 }
  0x10   : > { %s169_s25 = scalar_lea.vmem %s654_s0, %s461_s20  ;;  %507 = vmatpush3.bf16.msra.mxu0 %v552_v2  ;;  %524 = vmatpush3.bf16.msra.mxu1 %v552_v2  ;;  %s182_s28 = scalar_lea.vmem %s656_s2, %s461_s20 }
  0x11   : > { %v554_v4 = vld [vmem:[%s169_s25] sm:$0xff]   ;;  %v555_v5 = vld [vmem:[%s169_s25 + $0x10] sm:$0xff]   ;;  %508 = vmatprep.subr.bf16.mxu0 %v553_v3  ;;  %521 = vmatprep.subr.bf16.mxu1 %v553_v3  ;;  %v556_v6 = vld [vmem:[%s169_s25 + $0x8] sm:$0xff]  }
  0x12   : > { %510 = vmatprep.mubr.msk.bf16.mxu0 %vm245_vm0, %v554_v4  ;;  %514 = vmatprep.mubr.msk.bf16.mxu1 %vm245_vm0, %v555_v5  ;;  %v557_v7 = vld [vmem:[%s169_s25 + $0x18] sm:$0xff]  }
  0x14   : > { %509 = vmatpush3.bf16.msra.mxu0 %v553_v3  ;;  %525 = vmatpush3.bf16.msra.mxu1 %v553_v3 }
  0x17   : > { %511 = vmatmul.mubr.msk.bf16.vlgmr.msra.gmra.mrb[0].mxu0 %vm245_vm0, %v556_v6  ;;  %515 = vmatmul.mubr.msk.bf16.vlgmr.msra.gmra.mrb[0].mxu1 %vm245_vm0, %v557_v7 }
  0xea   : > { %v512_v8 = vpop.f32.mrb[0].mxu0  ;;  %v516_v9 = vpop.f32.mrb[0].mxu1 }
  0xeb   : > { %v488_v10 = vpack.c.bf16 %v512_v8, %v512_v8  ;;  %v492_v11 = vpack.c.bf16 %v516_v9, %v516_v9  ;;  %v292_v12 = vpop.f32.mrb[1].mxu0  ;;  %v308_v13 = vpop.f32.mrb[1].mxu1 }
  0xec   : > { %v486_v14 = vpack.c.bf16 %v292_v12, %v292_v12  ;;  %v490_v15 = vpack.c.bf16 %v308_v13, %v308_v13  ;;  %v513_v16 = vpop.f32.mrb[2].mxu0  ;;  %v517_v17 = vpop.f32.mrb[2].mxu1 }
  0xed   : > { %358 = vst.msk [vmem:[%s182_s28 + $0x8] sm:$0xf] %vm355_vm1, %v488_v10  ;;  %362 = vst.msk [vmem:[%s182_s28 + $0x18] sm:$0xf] %vm355_vm1, %v492_v11  ;;  %v489_v18 = vpack.c.bf16 %v513_v16, %v513_v16  ;;  %v493_v19 = vpack.c.bf16 %v517_v17, %v517_v17  ;;  %v295_v20 = vpop.f32.mrb[3].mxu0  ;;  %v311_v21 = vpop.f32.mrb[3].mxu1 }
  0xee   : > { %356 = vst.msk [vmem:[%s182_s28] sm:$0xf] %vm355_vm1, %v486_v14  ;;  %360 = vst.msk [vmem:[%s182_s28 + $0x10] sm:$0xf] %vm355_vm1, %v490_v15  ;;  %v487_v22 = vpack.c.bf16 %v295_v20, %v295_v20  ;;  %v491_v23 = vpack.c.bf16 %v311_v21, %v311_v21 }
  0xef   : > { %359 = vst.msk [vmem:[%s182_s28 + $0xc] sm:$0xf] %vm355_vm1, %v489_v18  ;;  %363 = vst.msk [vmem:[%s182_s28 + $0x1c] sm:$0xf] %vm355_vm1, %v493_v19 }
  0xf0   : > { %357 = vst.msk [vmem:[%s182_s28 + $0x4] sm:$0xf] %vm355_vm1, %v487_v22  ;;  %361 = vst.msk [vmem:[%s182_s28 + $0x14] sm:$0xf] %vm355_vm1, %v491_v23 }
  0xf1 PF: > { %s12_s11 = sadd.s32 1, %s580_s11   ;;  %s657_s9 = smov %s576_s10 }
  0xf2   : > { %p9_p5 = scmp.ge.s32.totalorder %s12_s11, 4   ;;  %s658_s10 = smov %s660_s12 }
  0xf4   :  { %11 = sbr.rel (!%p9_p5) target bundleno = 2 (0x2), region = 61 }

// kernel: mgsl_kge_forward.6
= control target key start
LH: loop header
LB: loop body
LE: loop exit
PB: predicated region body
PF: predicated region fallthrough
CT: control target
= control target key end

     0   :  { %s1391_s21 = smov 0   ;;  %s1393_s22 = smov 0   ;;  %s1672_s0 = inlined_call_operand.vmem [shape: s32[4,128], index: 0, kind: input, shape index: {}]   ;;  %s1673_s1 = inlined_call_operand.vmem [shape: bf16[128,16], index: 1, kind: input, shape index: {}]   ;;  %s1674_s2 = inlined_call_operand.vmem [shape: bf16[16,128], index: 2, kind: input, shape index: {}]   ;;  %s1675_s3 = inlined_call_operand.vmem [shape: f32[1,128], index: 3, kind: input, shape index: {}]   ;;  %s1676_s4 = inlined_call_operand.vmem [shape: f32[128,1], index: 4, kind: input, shape index: {}]   ;;  %s1677_s5 = inlined_call_operand.vmem [shape: f32[128,128], index: 5, kind: input, shape index: {}]   ;;  %s1678_s6 = inlined_call_operand.vmem [shape: bf16[2,128,128], index: 6, kind: output, shape index: {}]  }
   0x1   :  { %s1395_s23 = smov 0   ;;  %s1397_s24 = smov 0  }
   0x2   :  { %s1399_s25 = smov 0  }
   0x3 LB: > { %s1085_s26 = sadd.s32 4294967295, %s1352_s25   ;;  %s28_s27 = sadd.s32 1, %s1348_s24  ;;  %s1352_s25 = sphi %s1399_s25, %s16_s25   ;;  %s1348_s24 = sphi %s1397_s24, %s1683_s24   ;;  %s1344_s23 = sphi %s1395_s23, %s1682_s23   ;;  %s1340_s22 = sphi %s1393_s22, %s1681_s22   ;;  %s1336_s21 = sphi %s1391_s21, %s1680_s21  }
   0x4   : > { %p30_p0 = scmp.ge.s32.totalorder %s28_s27, 2  ;;  %s195_s28 = sadd.s32 1, %s1340_s22 }
   0x5   : > { %p205_p1 = scmp.ne.s32.totalorder %s1340_s22, %s1336_s21  ;;  %p206_p2 = scmp.eq.s32.totalorder %s1085_s26, 1 }
   0x6   : > { %s1685_s27 = smov (%p30_p0, %s28_s27), 0  ;;  %p1092_p4 = scmp.ge.s32.totalorder %s1352_s25, 1 }
   0x7   : > { %p1423_p3 = por %p206_p2, %p205_p1  ;;  %s190_s30 = ssub.s32 %s1348_s24, %s1685_s27 }
   0x8   : > { %p280_p5 = scmp.lt.s32.totalorder %s1352_s25, 3  ;;  %p193_p6 = scmp.eq.s32.totalorder %s190_s30, 0 }
   0xa   : > { %p281_p7 = pnand %p1092_p4, %p280_p5 }
   0xb   : > { %s1432_s7 = scalar_select %p193_p6, %s1340_s22, %s195_s28  }
   0xc   : > { %284 = sbr.rel (%p281_p7) target bundleno = 256 (0x100), region = 44  ;;  %v1309_v0 = vld [vmem:[%s1674_s2] sm:$0xff] (!%p281_p7)   ;;  %s1094_s10 = sshll.u32 (!%p281_p7), %s1344_s23, 3  ;;  %v1354_v1 = vmov (!%p281_p7), 0   ;;  %vm599_vm0 = vcmask (!%p281_p7), 130048   ;;  %v369_v26 = vlaneseq (!%p281_p7)  ;;  %v1355_v37 = vmov (!%p281_p7), 0.0  }
   0xd   : > { %p338_p8 = scmp.lt.s32.totalorder (!%p281_p7), %s1094_s10, 15  ;;  %1253 = vmatprep.subr.bf16.mxu0 (!%p281_p7), %v1309_v0  ;;  %1263 = vmatprep.subr.bf16.mxu1 (!%p281_p7), %v1309_v0  ;;  %s330_s28 = sand.u32 (!%p281_p7), 1, %s1336_s21   ;;  %v1464_v33 = vld [vmem:[%s1672_s0] ss:$0 sm:$0xff] (!%p281_p7)  ;;  %v1471_v35 = vld [vmem:[%s1672_s0 + $0x1] ss:$0 sm:$0xff] (!%p281_p7) }
   0xe   : > { %1254 = vmatpush3.bf16.msra.mxu0 (!%p281_p7), %v1309_v0  ;;  %1264 = vmatpush3.bf16.msra.mxu1 (!%p281_p7), %v1309_v0  ;;  %s1093_s30 = sshll.u32 (!%p281_p7), %s330_s28, 6  ;;  %v370_v27 = vshrl.u32 (!%p281_p7), %v369_v26, 7  ;;  %s1100_s9 = sshll.u32 (!%p281_p7), %s1344_s23, 6  ;;  %v1459_v32 = vand.u32 (!%p281_p7), 127, %v369_v26  ;;  %v1483_v40 = vld [vmem:[%s1672_s0 + $0x2] ss:$0 sm:$0xff] (!%p281_p7) }
   0xf   : > { %1308 = vset.pattern.permute.xlu1 (!%p281_p7), %v1354_v1  ;;  %1307 = vset.pattern.permute.xlu0 (!%p281_p7), %v1354_v1  ;;  %s1452_s8 = scalar_lea.vmem (!%p281_p7), [#allocation2], %s1093_s30  ;;  %v378_v29 = vstv (!%p281_p7), %s1100_s9  ;;  %v1497_v47 = vld [vmem:[%s1672_s0 + $0x3] ss:$0 sm:$0xff] (!%p281_p7) }
  0x10   : > { %v372_v28 = vadd.s32 (!%p281_p7), 16, %v370_v27  ;;  %v376_v30 = vadd.s32 (!%p281_p7), 48, %v370_v27  ;;  %v1473_v36 = vadd.s32 (!%p281_p7), %v378_v29, %v370_v27  ;;  %v374_v41 = vadd.s32 (!%p281_p7), 32, %v370_v27 }
  0x11   : > { %v373_v46 = vadd.s32 (!%p281_p7), 24, %v370_v27  ;;  %v377_v53 = vadd.s32 (!%p281_p7), 56, %v370_v27  ;;  %v371_v54 = vadd.s32 (!%p281_p7), 8, %v370_v27  ;;  %v375_v56 = vadd.s32 (!%p281_p7), 40, %v370_v27 }
  0x12   : > { %v381_v31 = vadd.s32 (!%p281_p7), %v378_v29, %v372_v28  ;;  %v385_v34 = vadd.s32 (!%p281_p7), %v378_v29, %v376_v30  ;;  %vm391_vm6 = vcmp.eq.s32.totalorder (!%p281_p7), %v1459_v32, %v1473_v36  ;;  %vm420_vm7 = vcmp.eq.s32.totalorder (!%p281_p7), %v1464_v33, %v1473_v36 }
  0x13   : > { %s1687_s10 = smov (!%p338_p8, %s1094_s10), 15  ;;  %v1101_v49 = vsel %vm391_vm6, 1.0, %v1355_v37  ;;  %v1110_v50 = vsel %vm420_vm7, 1.0, %v1355_v37  ;;  %v1501_v51 = vadd.s32 %v378_v29, %v374_v41  ;;  %vm457_vm10 = vcmp.eq.s32.totalorder %v1471_v35, %v1473_v36  ;;  %s1200_s19 = sshll.u32 (%p1423_p3), %s1344_s23, 5 }
  0x14   : > { %s1095_s11 = sshll.u32 %s1687_s10, 2  ;;  %s1097_s12 = sshll.u32 %s1687_s10, 3  ;;  %vm393_vm1 = vcmp.eq.s32.totalorder %v1459_v32, %v381_v31  ;;  %vm422_vm2 = vcmp.eq.s32.totalorder %v1464_v33, %v381_v31  ;;  %vm397_vm3 = vcmp.eq.s32.totalorder %v1459_v32, %v385_v34  ;;  %vm426_vm4 = vcmp.eq.s32.totalorder %v1464_v33, %v385_v34 }
  0x15   : > { %s341_s15 = scalar_lea.vmem %s1673_s1, %s1095_s11  ;;  %s354_s18 = scalar_lea.vmem %s1676_s4, %s1097_s12  ;;  %v1103_v38 = vsel %vm393_vm1, 1.0, %v1355_v37  ;;  %v1112_v39 = vsel %vm422_vm2, 1.0, %v1355_v37  ;;  %vm459_vm5 = vcmp.eq.s32.totalorder %v1471_v35, %v381_v31  ;;  %v1107_v42 = vsel %vm397_vm3, 1.0, %v1355_v37 }
  0x16   : > { %v1310_v2 = vld [vmem:[%s341_s15] sm:$0xff]   ;;  %v1311_v3 = vld [vmem:[%s341_s15 + $0x10] sm:$0xff]   ;;  %v1312_v4 = vld [vmem:[%s341_s15 + $0x8] sm:$0xff]   ;;  %s363_s26 = scalar_lea.vmem %s1677_s5, %s1097_s12  ;;  %v1116_v43 = vsel %vm426_vm4, 1.0, %v1355_v37  ;;  %v446_v44 = vadd.f32 %v1112_v39, %v1103_v38  ;;  %vm463_vm8 = vcmp.eq.s32.totalorder %v1471_v35, %v385_v34  ;;  %v1121_v45 = vsel %vm459_vm5, 1.0, %v1355_v37  ;;  %s855_s28 = scalar_lea.vmem (%p1423_p3), %s1678_s6, %s1200_s19 }
  0x17   : > { %1255 = vmatprep.mubr.msk.bf16.mxu0 %vm599_vm0, %v1310_v2  ;;  %1259 = vmatprep.mubr.msk.bf16.mxu1 %vm599_vm0, %v1311_v3  ;;  %v1313_v5 = vld [vmem:[%s341_s15 + $0x18] sm:$0xff]   ;;  %v702_v6 = vld [vmem:[%s354_s18 + $0x10] sm:$0xff]  ;;  %v700_v7 = vld [vmem:[%s354_s18] sm:$0xff]  ;;  %vm496_vm9 = vcmp.eq.s32.totalorder %v1483_v40, %v381_v31  ;;  %v450_v48 = vadd.f32 %v1116_v43, %v1107_v42  ;;  %v1125_v52 = vsel %vm463_vm8, 1.0, %v1355_v37  ;;  %vm500_vm11 = vcmp.eq.s32.totalorder %v1483_v40, %v385_v34 }
  0x18   : > { %1256 = vmatmul.mubr.msk.bf16.vlgmr.msra.gmra.mrb[0].mxu0 %vm599_vm0, %v1312_v4  ;;  %1260 = vmatmul.mubr.msk.bf16.vlgmr.msra.gmra.mrb[0].mxu1 %vm599_vm0, %v1313_v5  ;;  %v703_v8 = vld [vmem:[%s354_s18 + $0x18] sm:$0xff]  ;;  %v701_v9 = vld [vmem:[%s354_s18 + $0x8] sm:$0xff]  ;;  %v704_v11 = vld [vmem:[%s354_s18 + $0x20] sm:$0xff]  ;;  %v483_v55 = vadd.f32 %v1121_v45, %v446_v44  ;;  %v1130_v57 = vsel %vm496_vm9, 1.0, %v1355_v37  ;;  %vm533_vm12 = vcmp.eq.s32.totalorder %v1497_v47, %v381_v31  ;;  %v444_v58 = vadd.f32 %v1110_v50, %v1101_v49 }
  0x19   : > { %720 = vperm.xlu1 %1308, %v702_v6   ;;  %710 = vperm.xlu0 %1307, %v700_v7   ;;  %v705_v10 = vld [vmem:[%s354_s18 + $0x28] sm:$0xff]  ;;  %v707_v12 = vld [vmem:[%s354_s18 + $0x38] sm:$0xff]  ;;  %v706_v13 = vld [vmem:[%s354_s18 + $0x30] sm:$0xff]  ;;  %v487_v59 = vadd.f32 %v1125_v52, %v450_v48  ;;  %v1119_v60 = vsel %vm457_vm10, 1.0, %v1355_v37  ;;  %vm395_vm13 = vcmp.eq.s32.totalorder %v1459_v32, %v1501_v51  ;;  %v1512_v61 = vadd.s32 %v378_v29, %v373_v46 }
  0x1a   : > { %v756_v14 = vld [vmem:[%s363_s26] sm:$0xff]  ;;  %v757_v15 = vld [vmem:[%s363_s26 + $0x8] sm:$0xff]  ;;  %v758_v16 = vld [vmem:[%s363_s26 + $0x10] sm:$0xff]  ;;  %v1134_v62 = vsel %vm500_vm11, 1.0, %v1355_v37  ;;  %vm494_vm14 = vcmp.eq.s32.totalorder %v1483_v40, %v1473_v36  ;;  %v1517_v63 = vadd.s32 %v378_v29, %v377_v53  ;;  %v1519_v0 = vadd.s32 %v378_v29, %v371_v54 }
  0x1b   : > { %v759_v17 = vld [vmem:[%s363_s26 + $0x18] sm:$0xff]  ;;  %v760_v18 = vld [vmem:[%s363_s26 + $0x20] sm:$0xff]  ;;  %v761_v19 = vld [vmem:[%s363_s26 + $0x28] sm:$0xff]  ;;  %v1204_v22 = vpack.c.bf16 %v757_v15, %v756_v14  ;;  %v1521_v1 = vadd.f32 %v1130_v57, %v483_v55  ;;  %v1524_v2 = vsel %vm533_vm12, 1.0, %v1355_v37  ;;  %v1526_v3 = vadd.s32 %v378_v29, %v375_v56 }
  0x1c   : > { %v762_v20 = vld [vmem:[%s363_s26 + $0x30] sm:$0xff]  ;;  %v763_v21 = vld [vmem:[%s363_s26 + $0x38] sm:$0xff]  ;;  %v1209_v23 = vpack.c.bf16 %v759_v17, %v758_v16  ;;  %v1214_v24 = vpack.c.bf16 %v761_v19, %v760_v18  ;;  %vm537_vm15 = vcmp.eq.s32.totalorder %v1497_v47, %v385_v34  ;;  %v481_v4 = vadd.f32 %v1119_v60, %v444_v58 }
  0x1d   : > { %725 = vperm.xlu1 %1308, %v703_v8   ;;  %715 = vperm.xlu0 %1307, %v701_v9   ;;  %v1219_v25 = vpack.c.bf16 %v763_v21, %v762_v20  ;;  %1205 = vst [vmem:[%s1452_s8] sm:$0xff] %v1204_v22   ;;  %v1105_v5 = vsel %vm395_vm13, 1.0, %v1355_v37  ;;  %vm424_vm0 = vcmp.eq.s32.totalorder %v1464_v33, %v1501_v51  ;;  %v1128_v7 = vsel %vm494_vm14, 1.0, %v1355_v37 }
  0x1e   : > { %1241 = vst [vmem:[%s1452_s8 + $0x8] sm:$0xff] %v1209_v23   ;;  %1242 = vst [vmem:[%s1452_s8 + $0x10] sm:$0xff] %v1214_v24   ;;  %v1532_v6 = vadd.f32 %v1134_v62, %v487_v59  ;;  %vm394_vm1 = vcmp.eq.s32.totalorder %v1459_v32, %v1512_v61  ;;  %vm423_vm2 = vcmp.eq.s32.totalorder %v1464_v33, %v1512_v61  ;;  %v1548_v8 = vsel %vm537_vm15, 1.0, %v1355_v37 }
  0x1f   : > { %1243 = vst [vmem:[%s1452_s8 + $0x18] sm:$0xff] %v1219_v25   ;;  %vm398_vm3 = vcmp.eq.s32.totalorder %v1459_v32, %v1517_v63  ;;  %vm427_vm4 = vcmp.eq.s32.totalorder %v1464_v33, %v1517_v63  ;;  %vm392_vm5 = vcmp.eq.s32.totalorder %v1459_v32, %v1519_v0  ;;  %vm421_vm6 = vcmp.eq.s32.totalorder %v1464_v33, %v1519_v0 }
  0x20   : > { %v1114_v9 = vsel %vm424_vm0, 1.0, %v1355_v37  ;;  %vm396_vm7 = vcmp.eq.s32.totalorder %v1459_v32, %v1526_v3  ;;  %vm425_vm8 = vcmp.eq.s32.totalorder %v1464_v33, %v1526_v3  ;;  %vm461_vm9 = vcmp.eq.s32.totalorder %v1471_v35, %v1501_v51 }
  0x21   : > { %735 = vperm.xlu1 %1308, %v705_v10   ;;  %730 = vperm.xlu0 %1307, %v704_v11   ;;  %v1104_v10 = vsel %vm394_vm1, 1.0, %v1355_v37  ;;  %v1113_v11 = vsel %vm423_vm2, 1.0, %v1355_v37  ;;  %vm460_vm10 = vcmp.eq.s32.totalorder %v1471_v35, %v1512_v61  ;;  %v1102_v14 = vsel %vm392_vm5, 1.0, %v1355_v37 }
  0x22   : > { %v1111_v15 = vsel %vm421_vm6, 1.0, %v1355_v37  ;;  %vm464_vm11 = vcmp.eq.s32.totalorder %v1471_v35, %v1517_v63  ;;  %vm458_vm12 = vcmp.eq.s32.totalorder %v1471_v35, %v1519_v0  ;;  %v1106_v16 = vsel %vm396_vm7, 1.0, %v1355_v37 }
  0x23   : > { %v1115_v17 = vsel %vm425_vm8, 1.0, %v1355_v37  ;;  %v448_v19 = vadd.f32 %v1114_v9, %v1105_v5  ;;  %vm498_vm13 = vcmp.eq.s32.totalorder %v1483_v40, %v1501_v51  ;;  %v447_v20 = vadd.f32 %v1113_v11, %v1104_v10 }
  0x24   : > { %vm462_vm14 = vcmp.eq.s32.totalorder %v1471_v35, %v1526_v3  ;;  %v1123_v22 = vsel %vm461_vm9, 1.0, %v1355_v37  ;;  %v1122_v23 = vsel %vm460_vm10, 1.0, %v1355_v37  ;;  %v445_v25 = vadd.f32 %v1111_v15, %v1102_v14 }
  0x25   : > { %745 = vperm.xlu1 %1308, %v707_v12   ;;  %740 = vperm.xlu0 %1307, %v706_v13   ;;  %v1108_v12 = vsel %vm398_vm3, 1.0, %v1355_v37  ;;  %v1117_v13 = vsel %vm427_vm4, 1.0, %v1355_v37  ;;  %vm497_vm15 = vcmp.eq.s32.totalorder %v1483_v40, %v1512_v61  ;;  %v1126_v26 = vsel %vm464_vm11, 1.0, %v1355_v37 }
  0x26   : > { %v451_v24 = vadd.f32 %v1117_v13, %v1108_v12  ;;  %v1120_v27 = vsel %vm458_vm12, 1.0, %v1355_v37  ;;  %v449_v28 = vadd.f32 %v1115_v17, %v1106_v16  ;;  %vm531_vm0 = vcmp.eq.s32.totalorder %v1497_v47, %v1473_v36 }
  0x27   : > { %vm501_vm1 = vcmp.eq.s32.totalorder %v1483_v40, %v1517_v63  ;;  %vm495_vm2 = vcmp.eq.s32.totalorder %v1483_v40, %v1519_v0  ;;  %v1124_v29 = vsel %vm462_vm14, 1.0, %v1355_v37  ;;  %v485_v30 = vadd.f32 %v1123_v22, %v448_v19 }
  0x28   : > { %v1132_v31 = vsel %vm498_vm13, 1.0, %v1355_v37  ;;  %v484_v32 = vadd.f32 %v1122_v23, %v447_v20  ;;  %vm499_vm3 = vcmp.eq.s32.totalorder %v1483_v40, %v1526_v3  ;;  %vm535_vm4 = vcmp.eq.s32.totalorder %v1497_v47, %v1501_v51 }
  0x29   : > { %v1131_v33 = vsel %vm497_vm15, 1.0, %v1355_v37  ;;  %v488_v34 = vadd.f32 %v1126_v26, %v451_v24  ;;  %v482_v35 = vadd.f32 %v1120_v27, %v445_v25  ;;  %vm534_vm5 = vcmp.eq.s32.totalorder %v1497_v47, %v1512_v61 }
  0x2a   : > { %v1135_v39 = vsel %vm501_vm1, 1.0, %v1355_v37  ;;  %v1129_v41 = vsel %vm495_vm2, 1.0, %v1355_v37  ;;  %v486_v42 = vadd.f32 %v1124_v29, %v449_v28  ;;  %v518_v44 = vadd.f32 %v1128_v7, %v481_v4 }
  0x2b   : > { %vm538_vm6 = vcmp.eq.s32.totalorder %v1497_v47, %v1517_v63  ;;  %vm532_vm7 = vcmp.eq.s32.totalorder %v1497_v47, %v1519_v0  ;;  %v1133_v40 = vsel %vm499_vm3, 1.0, %v1355_v37  ;;  %v1137_v45 = vsel %vm531_vm0, 1.0, %v1355_v37  ;;  %v1154_v63 = vld [vmem:[%s1675_s3] ss:$0 sm:$0xff] }
  0x2c   : > { %v522_v46 = vadd.f32 %v1132_v31, %v485_v30  ;;  %v521_v48 = vadd.f32 %v1131_v33, %v484_v32  ;;  %vm536_vm8 = vcmp.eq.s32.totalorder %v1497_v47, %v1526_v3  ;;  %v1141_v49 = vsel %vm535_vm4, 1.0, %v1355_v37 }
  0x2d   : > { %v1140_v50 = vsel %vm534_vm5, 1.0, %v1355_v37  ;;  %v525_v52 = vadd.f32 %v1135_v39, %v488_v34  ;;  %v519_v53 = vadd.f32 %v1129_v41, %v482_v35  ;;  %v557_v54 = vadd.f32 %v1524_v2, %v1521_v1 }
  0x2e   : > { %v1144_v36 = vsel %vm538_vm6, 1.0, %v1355_v37  ;;  %v1138_v55 = vsel %vm532_vm7, 1.0, %v1355_v37  ;;  %v523_v56 = vadd.f32 %v1133_v40, %v486_v42  ;;  %v561_v57 = vadd.f32 %v1548_v8, %v1532_v6 }
  0x2f   : > { %v555_v58 = vadd.f32 %v1137_v45, %v518_v44  ;;  %v1142_v59 = vsel %vm536_vm8, 1.0, %v1355_v37  ;;  %v559_v51 = vadd.f32 %v1141_v49, %v522_v46  ;;  %v558_v60 = vadd.f32 %v1140_v50, %v521_v48 }
  0x30   : > { %v562_v0 = vadd.f32 %v1144_v36, %v525_v52  ;;  %v556_v1 = vadd.f32 %v1138_v55, %v519_v53  ;;  %v560_v5 = vadd.f32 %v1142_v59, %v523_v56 }
  0x98   : > { %v1571_v18 = vpop.permute.xlu1 %720  ;;  %v1577_v21 = vpop.permute.xlu0 %710 }
  0x9c   : > { %v726_v38 = vpop.permute.xlu1 %725  ;;  %v716_v43 = vpop.permute.xlu0 %715 }
  0xa0   : > { %v736_v47 = vpop.permute.xlu1 %735  ;;  %v731_v61 = vpop.permute.xlu0 %730 }
  0xa4   : > { %v746_v26 = vpop.permute.xlu1 %745  ;;  %v741_v27 = vpop.permute.xlu0 %740 }
  0xeb   : > { %v1257_v62 = vpop.f32.mrb[0].mxu0  ;;  %v1261_v3 = vpop.f32.mrb[0].mxu1 }
  0xec   : > { %v679_v2 = vmul.f32 %v1257_v62, %v557_v54  ;;  %v646_v4 = vpop.f32.mrb[1].mxu0  ;;  %v683_v7 = vmul.f32 %v1261_v3, %v561_v57  ;;  %v662_v8 = vpop.f32.mrb[1].mxu1 }
  0xed   : > { %v677_v6 = vmul.f32 %v646_v4, %v555_v58  ;;  %v1258_v9 = vpop.f32.mrb[2].mxu0  ;;  %v681_v10 = vmul.f32 %v662_v8, %v559_v51  ;;  %v1262_v12 = vpop.f32.mrb[2].mxu1 }
  0xee   : > { %v694_v37 = vmul.f32 %v1154_v63, %v679_v2  ;;  %v680_v11 = vmul.f32 %v1258_v9, %v558_v60  ;;  %v649_v13 = vpop.f32.mrb[3].mxu0  ;;  %v698_v14 = vmul.f32 %v1154_v63, %v683_v7  ;;  %v684_v16 = vmul.f32 %v1262_v12, %v562_v0  ;;  %v665_v19 = vpop.f32.mrb[3].mxu1 }
  0xef   : > { %v692_v15 = vmul.f32 %v1154_v63, %v677_v6  ;;  %v678_v17 = vmul.f32 %v649_v13, %v556_v1  ;;  %v696_v20 = vmul.f32 %v1154_v63, %v681_v10  ;;  %v682_v23 = vmul.f32 %v665_v19, %v560_v5 }
  0xf0   : > { %v695_v22 = vmul.f32 %v1154_v63, %v680_v11  ;;  %v699_v24 = vmul.f32 %v1154_v63, %v684_v16  ;;  %v750_v28 = vmul.f32 %v1571_v18, %v694_v37  ;;  %v754_v31 = vmul.f32 %v741_v27, %v698_v14  ;;  %v871_v18 = vld [vmem:[%s1452_s8] sm:$0xff] (%p1423_p3)  }
  0xf1   : > { %v693_v25 = vmul.f32 %v1154_v63, %v678_v17  ;;  %v697_v30 = vmul.f32 %v1154_v63, %v682_v23  ;;  %v748_v32 = vmul.f32 %v1577_v21, %v692_v15  ;;  %v752_v35 = vmul.f32 %v731_v61, %v696_v20  ;;  %851 = sbr.rel (!%p1423_p3) target bundleno = 256 (0x100), region = 48  ;;  %v875_v21 = vld [vmem:[%s1452_s8 + $0x8] sm:$0xff] (%p1423_p3)   ;;  %872 = vst [vmem:[%s855_s28] sm:$0xff] (%p1423_p3), %v871_v18  }
  0xf2   : > { %v751_v29 = vmul.f32 %v726_v38, %v695_v22  ;;  %v755_v33 = vmul.f32 %v746_v26, %v699_v24  ;;  %v879_v38 = vld [vmem:[%s1452_s8 + $0x10] sm:$0xff] (%p1423_p3)   ;;  %876 = vst [vmem:[%s855_s28 + $0x8] sm:$0xff] (%p1423_p3), %v875_v21  }
  0xf3   : > { %v749_v34 = vmul.f32 %v716_v43, %v693_v25  ;;  %v753_v41 = vmul.f32 %v736_v47, %v697_v30  ;;  %v883_v43 = vld [vmem:[%s1452_s8 + $0x18] sm:$0xff] (%p1423_p3)   ;;  %880 = vst [vmem:[%s855_s28 + $0x10] sm:$0xff] (%p1423_p3), %v879_v38  }
  0xf4   : > { %v1229_v39 = vpack.c.bf16 %v751_v29, %v750_v28  ;;  %v1239_v42 = vpack.c.bf16 %v755_v33, %v754_v31  ;;  %884 = vst [vmem:[%s855_s28 + $0x18] sm:$0xff] (%p1423_p3), %v883_v43  }
  0xf5   : > { %v1224_v44 = vpack.c.bf16 %v749_v34, %v748_v32  ;;  %v1234_v40 = vpack.c.bf16 %v753_v41, %v752_v35 }
  0xf6   : > { %1245 = vst [vmem:[%s1452_s8 + $0x28] sm:$0xff] %v1229_v39   ;;  %1247 = vst [vmem:[%s1452_s8 + $0x38] sm:$0xff] %v1239_v42  }
  0xf7   : > { %1244 = vst [vmem:[%s1452_s8 + $0x20] sm:$0xff] %v1224_v44   ;;  %1246 = vst [vmem:[%s1452_s8 + $0x30] sm:$0xff] %v1234_v40  }
  0xfd   : > { %v891_v46 = vld [vmem:[%s1452_s8 + $0x28] sm:$0xff]   ;;  %v899_v49 = vld [vmem:[%s1452_s8 + $0x38] sm:$0xff]  }
  0xfe   : > { %v887_v45 = vld [vmem:[%s1452_s8 + $0x20] sm:$0xff]   ;;  %892 = vst [vmem:[%s855_s28 + $0x48] sm:$0xff] %v891_v46   ;;  %v895_v48 = vld [vmem:[%s1452_s8 + $0x30] sm:$0xff]   ;;  %900 = vst [vmem:[%s855_s28 + $0x58] sm:$0xff] %v899_v49  }
  0xff   : > { %888 = vst [vmem:[%s855_s28 + $0x40] sm:$0xff] %v887_v45   ;;  %896 = vst [vmem:[%s855_s28 + $0x50] sm:$0xff] %v895_v48  }
 0x100 PF: > { %s16_s25 = sadd.s32 1, %s1352_s25   ;;  %s1680_s21 = smov %s1340_s22 }
 0x101   : > { %p13_p9 = scmp.ge.s32.totalorder %s16_s25, 4   ;;  %s1681_s22 = smov %s1432_s7 }
 0x102   : > { %s1682_s23 = smov %s1348_s24  ;;  %s1683_s24 = smov %s1685_s27 }
 0x103   :  { %15 = sbr.rel (!%p13_p9) target bundleno = 3 (0x3), region = 131 }

// kernel: mgsl_kge_forward.9
= control target key start
LH: loop header
LB: loop body
LE: loop exit
PB: predicated region body
PF: predicated region fallthrough
CT: control target
= control target key end

     0   :  { %s879_s12 = smov 0   ;;  %s881_s13 = smov 0   ;;  %s1021_s0 = inlined_call_operand.vmem [shape: bf16[2,128,128], index: 0, kind: input, shape index: {}]   ;;  %s1022_s1 = inlined_call_operand.vmem [shape: bf16[2,128,8], index: 1, kind: input, shape index: {}]   ;;  %s1023_s2 = inlined_call_operand.vmem [shape: f32[1,8], index: 2, kind: input, shape index: {}]   ;;  %s1024_s3 = inlined_call_operand.vmem [shape: f32[2,128,8], index: 3, kind: output, shape index: {}]  }
   0x1   :  { %s883_s14 = smov 0   ;;  %s885_s15 = smov 0  }
   0x2   :  { %s887_s16 = smov 0  }
   0x3 LB: > { %s28_s17 = sadd.s32 1, %s848_s14  ;;  %s32_s18 = sadd.s32 1, %s852_s15  ;;  %s856_s16 = sphi %s887_s16, %s13_s16   ;;  %s852_s15 = sphi %s885_s15, %s1028_s15   ;;  %s848_s14 = sphi %s883_s14, %s1027_s14   ;;  %s844_s13 = sphi %s881_s13, %s1026_s13   ;;  %s840_s12 = sphi %s879_s12, %s1025_s12  }
   0x4   : > { %p30_p0 = scmp.ge.s32.totalorder %s28_s17, 2  ;;  %p672_p1 = scmp.ge.s32.totalorder %s856_s16, 1 }
   0x5   : > { %p187_p2 = scmp.lt.s32.totalorder %s856_s16, 5 }
   0x6   : > { %s1030_s17 = smov (%p30_p0, %s28_s17), 0  ;;  %s1032_s18 = smov (!%p30_p0, %s32_s18), %s852_s15 }
   0x7   : > { %p188_p3 = pnand %p672_p1, %p187_p2  ;;  %p34_p4 = scmp.ge.s32.totalorder %s1032_s18, 2 }
   0x8   : > { %p232_p5 = scmp.lt.s32.totalorder (!%p188_p3), %s844_s13, 1  ;;  %s673_s19 = sshll.u32 (!%p188_p3), %s840_s12, 3  ;;  %vm269_vm0 = vcmask (!%p188_p3), 64512   ;;  %v858_v0 = vmov (!%p188_p3), 0.0   ;;  %v693_v37 = vld [vmem:[%s1023_s2] ss:$0 sm:$0xff] (!%p188_p3) }
   0x9   : > { %s1034_s18 = smov (%p34_p4, %s1032_s18), 0  ;;  %191 = sbr.rel (%p188_p3) target bundleno = 450 (0x1c2), region = 32 }
   0xa   : > { %p234_p6 = scmp.lt.s32.totalorder (!%p188_p3), %s673_s19, 15  ;;  %272 = vst.msk [vmem:[#allocation2 + $0x10] sm:$0xff] (!%p188_p3), %vm269_vm0, %v858_v0  ;;  %270 = vst.msk [vmem:[#allocation2] sm:$0xff] (!%p188_p3), %vm269_vm0, %v858_v0 }
   0xb   : > { %271 = vst.msk [vmem:[#allocation2 + $0x8] sm:$0xff] (!%p188_p3), %vm269_vm0, %v858_v0  ;;  %273 = vst.msk [vmem:[#allocation2 + $0x18] sm:$0xff] (!%p188_p3), %vm269_vm0, %v858_v0 }
   0xc   : > { %274 = vst.msk [vmem:[#allocation2 + $0x20] sm:$0xff] (!%p188_p3), %vm269_vm0, %v858_v0  ;;  %275 = vst.msk [vmem:[#allocation2 + $0x28] sm:$0xff] (!%p188_p3), %vm269_vm0, %v858_v0 }
   0xd   : > { %276 = vst.msk [vmem:[#allocation2 + $0x30] sm:$0xff] (!%p188_p3), %vm269_vm0, %v858_v0  ;;  %277 = vst.msk [vmem:[#allocation2 + $0x38] sm:$0xff] (!%p188_p3), %vm269_vm0, %v858_v0 }
  0x10   : > { %s1036_s13 = smov (!%p232_p5, %s844_s13), 1  ;;  %s1038_s19 = smov (!%p234_p6, %s673_s19), 15 }
  0x11   : > { %s696_s20 = sshll.u32 %s1036_s13, 6  ;;  %s674_s21 = sshll.u32 %s1036_s13, 4  ;;  %v280_v13 = vld [vmem:[#allocation2 + $0x10] sm:$0xff]  ;;  %v278_v15 = vld [vmem:[#allocation2] sm:$0xff] }
  0x12   : > { %s923_s24 = scalar_lea.vmem %s1022_s1, %s696_s20  ;;  %s925_s25 = sadd.s32 %s674_s21, %s1038_s19  ;;  %v281_v19 = vld [vmem:[#allocation2 + $0x18] sm:$0xff]  ;;  %v279_v25 = vld [vmem:[#allocation2 + $0x8] sm:$0xff] }
  0x13   : > { %v790_v1 = vld [vmem:[%s923_s24] sm:$0xff]   ;;  %v791_v2 = vld [vmem:[%s923_s24 + $0x8] sm:$0xff]   ;;  %s675_s26 = sshll.u32 %s925_s25, 2  ;;  %v792_v3 = vld [vmem:[%s923_s24 + $0x10] sm:$0xff]   ;;  %s680_s5 = sshll.u32 %s925_s25, 3 }
  0x14   : > { %709 = vmatprep.subr.bf16.mxu0 %v790_v1  ;;  %733 = vmatprep.subr.bf16.mxu1 %v790_v1  ;;  %s934_s29 = scalar_lea.vmem %s1021_s0, %s675_s26  ;;  %v793_v4 = vld [vmem:[%s923_s24 + $0x18] sm:$0xff]   ;;  %v794_v7 = vld [vmem:[%s923_s24 + $0x20] sm:$0xff]   ;;  %v795_v8 = vld [vmem:[%s923_s24 + $0x28] sm:$0xff]   ;;  %s262_s8 = scalar_lea.vmem %s1024_s3, %s680_s5 }
  0x15   : > { %710 = vmatpush3.bf16.msra.mxu0 %v790_v1  ;;  %741 = vmatpush3.bf16.msra.mxu1 %v790_v1  ;;  %v798_v5 = vld [vmem:[%s934_s29] sm:$0xff]   ;;  %v800_v6 = vld [vmem:[%s934_s29 + $0x10] sm:$0xff]   ;;  %v797_v10 = vld [vmem:[%s923_s24 + $0x38] sm:$0xff]  }
  0x16   : > { %711 = vmatprep.subr.bf16.mxu0 %v791_v2  ;;  %734 = vmatprep.subr.bf16.mxu1 %v791_v2  ;;  %v796_v9 = vld [vmem:[%s923_s24 + $0x30] sm:$0xff]   ;;  %v799_v11 = vld [vmem:[%s934_s29 + $0x8] sm:$0xff]   ;;  %v801_v12 = vld [vmem:[%s934_s29 + $0x18] sm:$0xff]  }
  0x17   : > { %725 = vmatprep.mubr.bf16.mxu0 %v798_v5  ;;  %729 = vmatprep.mubr.bf16.mxu1 %v800_v6  ;;  %v284_v14 = vld [vmem:[#allocation2 + $0x30] sm:$0xff]  ;;  %v282_v16 = vld [vmem:[#allocation2 + $0x20] sm:$0xff]  ;;  %v285_v20 = vld [vmem:[#allocation2 + $0x38] sm:$0xff] }
  0x18   : > { %v283_v26 = vld [vmem:[#allocation2 + $0x28] sm:$0xff] }
  0x19   : > { %712 = vmatpush3.bf16.msra.mxu0 %v791_v2  ;;  %742 = vmatpush3.bf16.msra.mxu1 %v791_v2 }
  0x1a   : > { %713 = vmatprep.subr.bf16.mxu0 %v792_v3  ;;  %735 = vmatprep.subr.bf16.mxu1 %v792_v3 }
  0x1d   : > { %714 = vmatpush3.bf16.msra.mxu0 %v792_v3  ;;  %743 = vmatpush3.bf16.msra.mxu1 %v792_v3 }
  0x1e   : > { %715 = vmatprep.subr.bf16.mxu0 %v793_v4  ;;  %736 = vmatprep.subr.bf16.mxu1 %v793_v4 }
  0x21   : > { %716 = vmatpush3.bf16.msra.mxu0 %v793_v4  ;;  %744 = vmatpush3.bf16.msra.mxu1 %v793_v4 }
  0x22   : > { %717 = vmatprep.subr.bf16.mxu0 %v794_v7  ;;  %737 = vmatprep.subr.bf16.mxu1 %v794_v7 }
  0x25   : > { %718 = vmatpush3.bf16.msra.mxu0 %v794_v7  ;;  %745 = vmatpush3.bf16.msra.mxu1 %v794_v7 }
  0x26   : > { %719 = vmatprep.subr.bf16.mxu0 %v795_v8  ;;  %738 = vmatprep.subr.bf16.mxu1 %v795_v8 }
  0x29   : > { %720 = vmatpush3.bf16.msra.mxu0 %v795_v8  ;;  %746 = vmatpush3.bf16.msra.mxu1 %v795_v8 }
  0x2a   : > { %721 = vmatprep.subr.bf16.mxu0 %v796_v9  ;;  %739 = vmatprep.subr.bf16.mxu1 %v796_v9 }
  0x2d   : > { %722 = vmatpush3.bf16.msra.mxu0 %v796_v9  ;;  %747 = vmatpush3.bf16.msra.mxu1 %v796_v9 }
  0x2e   : > { %723 = vmatprep.subr.bf16.mxu0 %v797_v10  ;;  %740 = vmatprep.subr.bf16.mxu1 %v797_v10 }
  0x31   : > { %724 = vmatpush3.bf16.msra.mxu0 %v797_v10  ;;  %748 = vmatpush3.bf16.msra.mxu1 %v797_v10 }
  0x34   : > { %726 = vmatmul.mubr.bf16.vlgmr.msra.gmra.mrb[0].mxu0 %v799_v11  ;;  %730 = vmatmul.mubr.bf16.vlgmr.msra.gmra.mrb[0].mxu1 %v801_v12 }
 0x107   : > { %v727_v17 = vpop.f32.mrb[0].mxu0  ;;  %v731_v18 = vpop.f32.mrb[0].mxu1 }
 0x108   : > { %v449_v21 = vadd.f32 %v727_v17, %v280_v13  ;;  %v416_v22 = vpop.f32.mrb[1].mxu0  ;;  %v453_v23 = vadd.f32 %v731_v18, %v284_v14  ;;  %v432_v24 = vpop.f32.mrb[1].mxu1 }
 0x109   : > { %v447_v27 = vadd.f32 %v416_v22, %v278_v15  ;;  %v728_v28 = vpop.f32.mrb[2].mxu0  ;;  %v451_v29 = vadd.f32 %v432_v24, %v282_v16  ;;  %v732_v30 = vpop.f32.mrb[2].mxu1 }
 0x10a   : > { %458 = vst.msk [vmem:[#allocation2 + $0x10] sm:$0xff] %vm269_vm0, %v449_v21  ;;  %462 = vst.msk [vmem:[#allocation2 + $0x30] sm:$0xff] %vm269_vm0, %v453_v23  ;;  %v450_v31 = vadd.f32 %v728_v28, %v281_v19  ;;  %v419_v32 = vpop.f32.mrb[3].mxu0  ;;  %v454_v33 = vadd.f32 %v732_v30, %v285_v20  ;;  %v435_v34 = vpop.f32.mrb[3].mxu1 }
 0x10b   : > { %456 = vst.msk [vmem:[#allocation2] sm:$0xff] %vm269_vm0, %v447_v27  ;;  %460 = vst.msk [vmem:[#allocation2 + $0x20] sm:$0xff] %vm269_vm0, %v451_v29  ;;  %v448_v35 = vadd.f32 %v419_v32, %v279_v25  ;;  %v452_v36 = vadd.f32 %v435_v34, %v283_v26 }
 0x10c   : > { %459 = vst.msk [vmem:[#allocation2 + $0x18] sm:$0xff] %vm269_vm0, %v450_v31  ;;  %463 = vst.msk [vmem:[#allocation2 + $0x38] sm:$0xff] %vm269_vm0, %v454_v33 }
 0x10d   : > { %457 = vst.msk [vmem:[#allocation2 + $0x8] sm:$0xff] %vm269_vm0, %v448_v35  ;;  %461 = vst.msk [vmem:[#allocation2 + $0x28] sm:$0xff] %vm269_vm0, %v452_v36 }
 0x111   : > { %v469_v38 = vld [vmem:[#allocation2 + $0x10] sm:$0xff] }
 0x112   : > { %v956_v39 = vadd.f32 %v693_v37, %v469_v38  ;;  %v467_v40 = vld [vmem:[#allocation2] sm:$0xff]  ;;  %v473_v57 = vld [vmem:[#allocation2 + $0x30] sm:$0xff] }
 0x113   : > { %v471_v41 = vld [vmem:[#allocation2 + $0x20] sm:$0xff]  ;;  %v958_v42 = vadd.f32 %v693_v37, %v467_v40  ;;  %v470_v43 = vld [vmem:[#allocation2 + $0x18] sm:$0xff]  ;;  %v488_v63 = vadd.f32 %v693_v37, %v473_v57 }
 0x114   : > { %v960_v44 = vadd.f32 %v693_v37, %v471_v41  ;;  %v492_v45 = vmul.f32 %v956_v39, %v956_v39  ;;  %v964_v46 = vadd.f32 %v693_v37, %v470_v43  ;;  %v472_v47 = vld [vmem:[#allocation2 + $0x28] sm:$0xff]  ;;  %v474_v56 = vld [vmem:[#allocation2 + $0x38] sm:$0xff] }
 0x115   : > { %v468_v48 = vld [vmem:[#allocation2 + $0x8] sm:$0xff]  ;;  %v490_v49 = vmul.f32 %v958_v42, %v958_v42  ;;  %v973_v53 = vadd.f32 %v693_v37, %v472_v47  ;;  %v489_v61 = vadd.f32 %v693_v37, %v474_v56  ;;  %v496_v3 = vmul.f32 %v488_v63, %v488_v63 }
 0x116   : > { %v494_v50 = vmul.f32 %v960_v44, %v960_v44  ;;  %v504_v51 = vsel %vm269_vm0, %v492_v45, 0.0  ;;  %v493_v52 = vmul.f32 %v964_v46, %v964_v46  ;;  %v976_v55 = vadd.f32 %v693_v37, %v468_v48 }
 0x117   : > { %505 = vadd.xlane.f32.xlu1 %v504_v51  ;;  %v498_v54 = vsel %vm269_vm0, %v490_v49, 0.0  ;;  %v495_v60 = vmul.f32 %v973_v53, %v973_v53  ;;  %v497_v1 = vmul.f32 %v489_v61, %v489_v61  ;;  %v516_v5 = vsel %vm269_vm0, %v496_v3, 0.0 }
 0x118   : > { %499 = vadd.xlane.f32.xlu0 %v498_v54  ;;  %v510_v58 = vsel %vm269_vm0, %v494_v50, 0.0  ;;  %v507_v59 = vsel %vm269_vm0, %v493_v52, 0.0  ;;  %v491_v62 = vmul.f32 %v976_v55, %v976_v55 }
 0x119   : > { %v513_v0 = vsel %vm269_vm0, %v495_v60, 0.0  ;;  %v519_v4 = vsel %vm269_vm0, %v497_v1, 0.0 }
 0x11a   : > { %v501_v2 = vsel %vm269_vm0, %v491_v62, 0.0 }
 0x11b   : > { %508 = vadd.xlane.f32.xlu1 %v507_v59 }
 0x11c   : > { %511 = vadd.xlane.f32.xlu0 %v510_v58 }
 0x11f   : > { %514 = vadd.xlane.f32.xlu1 %v513_v0 }
 0x120   : > { %502 = vadd.xlane.f32.xlu0 %v501_v2 }
 0x123   : > { %520 = vadd.xlane.f32.xlu1 %v519_v4 }
 0x124   : > { %517 = vadd.xlane.f32.xlu0 %v516_v5 }
 0x1a4   : > { %v506_v6 = vpop.xlane.xlu1 %505 }
 0x1a5   : > { %v524_v7 = vmax.f32 %v506_v6, 1e-24  ;;  %v500_v8 = vpop.xlane.xlu0 %499 }
 0x1a6   : > { %v522_v9 = vmax.f32 %v500_v8, 1e-24 }
 0x1a7   : > { %802 = vrsqrt.f32 %v524_v7 }
 0x1a8   : > { %804 = vrsqrt.f32 %v522_v9  ;;  %v509_v10 = vpop.xlane.xlu1 %508 }
 0x1a9   : > { %v525_v11 = vmax.f32 %v509_v10, 1e-24  ;;  %v512_v12 = vpop.xlane.xlu0 %511 }
 0x1aa   : > { %v526_v13 = vmax.f32 %v512_v12, 1e-24 }
 0x1ab   : > { %806 = vrsqrt.f32 %v525_v11 }
 0x1ac   : > { %808 = vrsqrt.f32 %v526_v13  ;;  %v515_v14 = vpop.xlane.xlu1 %514 }
 0x1ad   : > { %v527_v15 = vmax.f32 %v515_v14, 1e-24  ;;  %v503_v16 = vpop.xlane.xlu0 %502 }
 0x1ae   : > { %v523_v17 = vmax.f32 %v503_v16, 1e-24 }
 0x1af   : > { %810 = vrsqrt.f32 %v527_v15 }
 0x1b0   : > { %812 = vrsqrt.f32 %v523_v17  ;;  %v521_v18 = vpop.xlane.xlu1 %520 }
 0x1b1   : > { %v803_v19 = vpop.eup %802  ;;  %v529_v20 = vmax.f32 %v521_v18, 1e-24  ;;  %v518_v21 = vpop.xlane.xlu0 %517 }
 0x1b2   : > { %v805_v22 = vpop.eup %804  ;;  %v540_v23 = vmul.f32 %v803_v19, %v956_v39  ;;  %v528_v24 = vmax.f32 %v518_v21, 1e-24 }
 0x1b3   : > { %v538_v25 = vmul.f32 %v805_v22, %v958_v42  ;;  %814 = vrsqrt.f32 %v529_v20 }
 0x1b4   : > { %548 = vst.msk [vmem:[%s262_s8 + $0x10] sm:$0xff] %vm269_vm0, %v540_v23  ;;  %816 = vrsqrt.f32 %v528_v24 }
 0x1b5   : > { %v807_v26 = vpop.eup %806  ;;  %546 = vst.msk [vmem:[%s262_s8] sm:$0xff] %vm269_vm0, %v538_v25 }
 0x1b6   : > { %v809_v27 = vpop.eup %808  ;;  %v541_v28 = vmul.f32 %v807_v26, %v964_v46 }
 0x1b7   : > { %v542_v29 = vmul.f32 %v809_v27, %v960_v44 }
 0x1b8   : > { %549 = vst.msk [vmem:[%s262_s8 + $0x18] sm:$0xff] %vm269_vm0, %v541_v28 }
 0x1b9   : > { %v811_v30 = vpop.eup %810  ;;  %550 = vst.msk [vmem:[%s262_s8 + $0x20] sm:$0xff] %vm269_vm0, %v542_v29 }
 0x1ba   : > { %v813_v31 = vpop.eup %812  ;;  %v543_v32 = vmul.f32 %v811_v30, %v973_v53 }
 0x1bb   : > { %v539_v33 = vmul.f32 %v813_v31, %v976_v55 }
 0x1bc   : > { %551 = vst.msk [vmem:[%s262_s8 + $0x28] sm:$0xff] %vm269_vm0, %v543_v32 }
 0x1bd   : > { %v815_v34 = vpop.eup %814  ;;  %547 = vst.msk [vmem:[%s262_s8 + $0x8] sm:$0xff] %vm269_vm0, %v539_v33 }
 0x1be   : > { %v817_v35 = vpop.eup %816  ;;  %v545_v36 = vmul.f32 %v815_v34, %v489_v61 }
 0x1bf   : > { %v544_v37 = vmul.f32 %v817_v35, %v488_v63 }
 0x1c0   : > { %553 = vst.msk [vmem:[%s262_s8 + $0x38] sm:$0xff] %vm269_vm0, %v545_v36 }
 0x1c1   : > { %552 = vst.msk [vmem:[%s262_s8 + $0x30] sm:$0xff] %vm269_vm0, %v544_v37 }
 0x1c2 PF: > { %s13_s16 = sadd.s32 1, %s856_s16   ;;  %s1025_s12 = smov %s848_s14 }
 0x1c3   : > { %p10_p7 = scmp.ge.s32.totalorder %s13_s16, 6   ;;  %s1026_s13 = smov %s852_s15 }
 0x1c4   : > { %s1027_s14 = smov %s1030_s17  ;;  %s1028_s15 = smov %s1034_s18 }
 0x1c5   :  { %12 = sbr.rel (!%p10_p7) target bundleno = 3 (0x3), region = 73 }

// kernel: mgsl_kge_forward.8
= control target key start
LH: loop header
LB: loop body
LE: loop exit
PB: predicated region body
PF: predicated region fallthrough
CT: control target
= control target key end

     0   :  { %s984_s15 = smov 0   ;;  %s986_s16 = smov 0   ;;  %s1109_s0 = inlined_call_operand.vmem [shape: bf16[2,128,128], index: 0, kind: input, shape index: {}]   ;;  %s1110_s1 = inlined_call_operand.vmem [shape: bf16[128,32], index: 1, kind: input, shape index: {}]   ;;  %s1111_s2 = inlined_call_operand.vmem [shape: f32[1,32], index: 2, kind: input, shape index: {}]   ;;  %s1112_s3 = inlined_call_operand.vmem [shape: bf16[32,8], index: 3, kind: input, shape index: {}]   ;;  %s1113_s4 = inlined_call_operand.vmem [shape: bf16[2,128,8], index: 4, kind: output, shape index: {}]  }
   0x1   :  { %s988_s17 = smov 0   ;;  %s990_s18 = smov 0  }
   0x2   :  { %s992_s19 = smov 0  }
   0x3 LB: > { %s29_s20 = sadd.s32 1, %s948_s17  ;;  %s33_s21 = sadd.s32 1, %s952_s18  ;;  %s956_s19 = sphi %s992_s19, %s14_s19   ;;  %s952_s18 = sphi %s990_s18, %s1117_s18   ;;  %s948_s17 = sphi %s988_s17, %s1116_s17   ;;  %s944_s16 = sphi %s986_s16, %s1115_s16   ;;  %s940_s15 = sphi %s984_s15, %s1114_s15  }
   0x4   : > { %p31_p0 = scmp.ge.s32.totalorder %s29_s20, 2  ;;  %p765_p1 = scmp.ge.s32.totalorder %s956_s19, 1 }
   0x5   : > { %p206_p2 = scmp.lt.s32.totalorder %s956_s19, 5 }
   0x6   : > { %s1119_s20 = smov (%p31_p0, %s29_s20), 0  ;;  %s1121_s21 = smov (!%p31_p0, %s33_s21), %s952_s18 }
   0x7   : > { %p207_p3 = pnand %p765_p1, %p206_p2  ;;  %p35_p4 = scmp.ge.s32.totalorder %s1121_s21, 2 }
   0x8   : > { %v904_v0 = vld [vmem:[%s1110_s1] sm:$0xff] (!%p207_p3)   ;;  %s766_s24 = sshll.u32 (!%p207_p3), %s940_s15, 3  ;;  %v905_v1 = vld [vmem:[%s1110_s1 + $0x8] sm:$0xff] (!%p207_p3)   ;;  %p249_p5 = scmp.lt.s32.totalorder (!%p207_p3), %s944_s16, 1  ;;  %v906_v2 = vld [vmem:[%s1110_s1 + $0x10] sm:$0xff] (!%p207_p3)   ;;  %vm282_vm0 = vcmask (!%p207_p3), 261120  }
   0x9   : > { %s1123_s21 = smov (%p35_p4, %s1121_s21), 0  ;;  %210 = sbr.rel (%p207_p3) target bundleno = 500 (0x1f4), region = 36 }
   0xa   : > { %827 = vmatprep.subr.bf16.mxu0 (!%p207_p3), %v904_v0  ;;  %p251_p6 = scmp.lt.s32.totalorder (!%p207_p3), %s766_s24, 15  ;;  %v907_v3 = vld [vmem:[%s1110_s1 + $0x18] sm:$0xff] (!%p207_p3)   ;;  %v958_v5 = vmov (!%p207_p3), 0.0   ;;  %v908_v6 = vld [vmem:[%s1110_s1 + $0x20] sm:$0xff] (!%p207_p3)   ;;  %v909_v7 = vld [vmem:[%s1110_s1 + $0x28] sm:$0xff] (!%p207_p3)   ;;  %vm640_vm1 = vcmask (!%p207_p3), 60416  }
   0xb   : > { %828 = vmatpush3.bf16.msra.mxu0 (!%p207_p3), %v904_v0  ;;  %285 = vst.msk [vmem:[#allocation2 + $0x10] sm:$0xff] (!%p207_p3), %vm282_vm0, %v958_v5  ;;  %283 = vst.msk [vmem:[#allocation2] sm:$0xff] (!%p207_p3), %vm282_vm0, %v958_v5  ;;  %v910_v8 = vld [vmem:[%s1110_s1 + $0x30] sm:$0xff] (!%p207_p3)   ;;  %v911_v9 = vld [vmem:[%s1110_s1 + $0x38] sm:$0xff] (!%p207_p3)  }
   0xc   : > { %829 = vmatprep.subr.bf16.mxu0 (!%p207_p3), %v905_v1  ;;  %284 = vst.msk [vmem:[#allocation2 + $0x8] sm:$0xff] (!%p207_p3), %vm282_vm0, %v958_v5  ;;  %286 = vst.msk [vmem:[#allocation2 + $0x18] sm:$0xff] (!%p207_p3), %vm282_vm0, %v958_v5  ;;  %v916_v13 = vld [vmem:[%s1112_s3] sm:$0xff] (!%p207_p3)   ;;  %v917_v14 = vld [vmem:[%s1112_s3 + $0x8] sm:$0xff] (!%p207_p3)  }
   0xd   : > { %287 = vst.msk [vmem:[#allocation2 + $0x20] sm:$0xff] (!%p207_p3), %vm282_vm0, %v958_v5  ;;  %288 = vst.msk [vmem:[#allocation2 + $0x28] sm:$0xff] (!%p207_p3), %vm282_vm0, %v958_v5  ;;  %851 = vmatprep.subr.bf16.mxu1 (!%p207_p3), %v916_v13  ;;  %v784_v34 = vld [vmem:[%s1111_s2] ss:$0 sm:$0xff] (!%p207_p3) }
   0xe   : > { %289 = vst.msk [vmem:[#allocation2 + $0x30] sm:$0xff] (!%p207_p3), %vm282_vm0, %v958_v5  ;;  %290 = vst.msk [vmem:[#allocation2 + $0x38] sm:$0xff] (!%p207_p3), %vm282_vm0, %v958_v5  ;;  %852 = vmatpush3.bf16.msra.mxu1 (!%p207_p3), %v916_v13 }
   0xf   : > { %830 = vmatpush3.bf16.msra.mxu0 (!%p207_p3), %v905_v1  ;;  %853 = vmatprep.subr.bf16.mxu1 (!%p207_p3), %v917_v14 }
  0x10   : > { %s1125_s16 = smov (!%p249_p5, %s944_s16), 1  ;;  %s1127_s24 = smov (!%p251_p6, %s766_s24), 15  ;;  %831 = vmatprep.subr.bf16.mxu0 %v906_v2 }
  0x11   : > { %s767_s29 = sshll.u32 %s1125_s16, 4 }
  0x12   : > { %s1023_s30 = sadd.s32 %s767_s29, %s1127_s24  ;;  %854 = vmatpush3.bf16.msra.mxu1 %v917_v14  ;;  %v293_v15 = vld [vmem:[#allocation2 + $0x10] sm:$0xff]  ;;  %v291_v16 = vld [vmem:[#allocation2] sm:$0xff] }
  0x13   : > { %s768_s5 = sshll.u32 %s1023_s30, 2  ;;  %832 = vmatpush3.bf16.msra.mxu0 %v906_v2  ;;  %v294_v18 = vld [vmem:[#allocation2 + $0x18] sm:$0xff]  ;;  %v292_v21 = vld [vmem:[#allocation2 + $0x8] sm:$0xff] }
  0x14   : > { %s1034_s10 = scalar_lea.vmem %s1109_s0, %s768_s5  ;;  %833 = vmatprep.subr.bf16.mxu0 %v907_v3  ;;  %v295_v28 = vld [vmem:[#allocation2 + $0x20] sm:$0xff]  ;;  %v296_v33 = vld [vmem:[#allocation2 + $0x28] sm:$0xff]  ;;  %s275_s8 = scalar_lea.vmem %s1113_s4, %s768_s5 }
  0x15   : > { %v912_v4 = vld [vmem:[%s1034_s10] sm:$0xff]   ;;  %v913_v10 = vld [vmem:[%s1034_s10 + $0x8] sm:$0xff]   ;;  %v914_v11 = vld [vmem:[%s1034_s10 + $0x10] sm:$0xff]  }
  0x16   : > { %843 = vmatprep.mubr.bf16.mxu0 %v912_v4  ;;  %v915_v12 = vld [vmem:[%s1034_s10 + $0x18] sm:$0xff]   ;;  %v297_v27 = vld [vmem:[#allocation2 + $0x30] sm:$0xff] }
  0x17   : > { %834 = vmatpush3.bf16.msra.mxu0 %v907_v3  ;;  %v298_v30 = vld [vmem:[#allocation2 + $0x38] sm:$0xff] }
  0x18   : > { %835 = vmatprep.subr.bf16.mxu0 %v908_v6 }
  0x1b   : > { %836 = vmatpush3.bf16.msra.mxu0 %v908_v6 }
  0x1c   : > { %837 = vmatprep.subr.bf16.mxu0 %v909_v7 }
  0x1f   : > { %838 = vmatpush3.bf16.msra.mxu0 %v909_v7 }
  0x20   : > { %839 = vmatprep.subr.bf16.mxu0 %v910_v8 }
  0x23   : > { %840 = vmatpush3.bf16.msra.mxu0 %v910_v8 }
  0x24   : > { %841 = vmatprep.subr.bf16.mxu0 %v911_v9 }
  0x27   : > { %842 = vmatpush3.bf16.msra.mxu0 %v911_v9 }
  0x2a   : > { %844 = vmatmul.mubr.bf16.vlgmr.msra.gmra.mrb[0].mxu0 %v913_v10 }
  0x2b   : > { %847 = vmatprep.mubr.bf16.mxu0 %v914_v11 }
  0x32   : > { %848 = vmatmul.mubr.bf16.gmra.mrb[4].mxu0 %v915_v12 }
  0xfd   : > { %v845_v17 = vpop.f32.mrb[0].mxu0 }
  0xfe   : > { %v462_v19 = vadd.f32 %v845_v17, %v293_v15  ;;  %v429_v20 = vpop.f32.mrb[1].mxu0 }
  0xff   : > { %v460_v22 = vadd.f32 %v429_v20, %v291_v16  ;;  %v846_v23 = vpop.f32.mrb[2].mxu0 }
 0x100   : > { %471 = vst.msk [vmem:[#allocation2 + $0x10] sm:$0xff] %vm282_vm0, %v462_v19  ;;  %v463_v24 = vadd.f32 %v846_v23, %v294_v18  ;;  %v432_v25 = vpop.f32.mrb[3].mxu0 }
 0x101   : > { %469 = vst.msk [vmem:[#allocation2] sm:$0xff] %vm282_vm0, %v460_v22  ;;  %v461_v26 = vadd.f32 %v432_v25, %v292_v21 }
 0x102   : > { %472 = vst.msk [vmem:[#allocation2 + $0x18] sm:$0xff] %vm282_vm0, %v463_v24 }
 0x103   : > { %470 = vst.msk [vmem:[#allocation2 + $0x8] sm:$0xff] %vm282_vm0, %v461_v26 }
 0x105   : > { %v849_v29 = vpop.f32.mrb[4].mxu0 }
 0x106   : > { %v466_v31 = vadd.f32 %v849_v29, %v297_v27  ;;  %v445_v32 = vpop.f32.mrb[5].mxu0 }
 0x107   : > { %v464_v35 = vadd.f32 %v445_v32, %v295_v28  ;;  %v850_v36 = vpop.f32.mrb[6].mxu0  ;;  %v482_v37 = vld [vmem:[#allocation2 + $0x10] sm:$0xff] }
 0x108   : > { %475 = vst.msk [vmem:[#allocation2 + $0x30] sm:$0xff] %vm282_vm0, %v466_v31  ;;  %v467_v38 = vadd.f32 %v850_v36, %v298_v30  ;;  %v448_v39 = vpop.f32.mrb[7].mxu0  ;;  %v480_v40 = vld [vmem:[#allocation2] sm:$0xff]  ;;  %v497_v45 = vadd.f32 %v784_v34, %v482_v37 }
 0x109   : > { %473 = vst.msk [vmem:[#allocation2 + $0x20] sm:$0xff] %vm282_vm0, %v464_v35  ;;  %v465_v41 = vadd.f32 %v448_v39, %v296_v33  ;;  %v495_v42 = vadd.f32 %v784_v34, %v480_v40  ;;  %v483_v43 = vld [vmem:[#allocation2 + $0x18] sm:$0xff] }
 0x10a   : > { %476 = vst.msk [vmem:[#allocation2 + $0x38] sm:$0xff] %vm282_vm0, %v467_v38  ;;  %v481_v44 = vld [vmem:[#allocation2 + $0x8] sm:$0xff]  ;;  %v498_v46 = vadd.f32 %v784_v34, %v483_v43  ;;  %v505_v51 = vmax.f32 %v497_v45, 0.0 }
 0x10b   : > { %474 = vst.msk [vmem:[#allocation2 + $0x28] sm:$0xff] %vm282_vm0, %v465_v41  ;;  %v496_v47 = vadd.f32 %v784_v34, %v481_v44  ;;  %v503_v49 = vmax.f32 %v495_v42, 0.0 }
 0x10c   : > { %v506_v48 = vmax.f32 %v498_v46, 0.0 }
 0x10d   : > { %v504_v50 = vmax.f32 %v496_v47, 0.0 }
 0x10e   : > { %v512_v54 = vpack.c.bf16 %v506_v48, %v505_v51 }
 0x10f   : > { %v511_v52 = vpack.c.bf16 %v504_v50, %v503_v49  ;;  %v486_v53 = vld [vmem:[#allocation2 + $0x30] sm:$0xff] }
 0x110   : > { %v484_v55 = vld [vmem:[#allocation2 + $0x20] sm:$0xff]  ;;  %v501_v59 = vadd.f32 %v784_v34, %v486_v53 }
 0x111   : > { %855 = vmatprep.mubr.msk.bf16.mxu1 %vm282_vm0, %v511_v52  ;;  %v499_v56 = vadd.f32 %v784_v34, %v484_v55  ;;  %v487_v57 = vld [vmem:[#allocation2 + $0x38] sm:$0xff] }
 0x112   : > { %856 = vmatmul.mubr.msk.bf16.vlgmr.msra.gmra.mrb[0].mxu1 %vm282_vm0, %v512_v54  ;;  %v485_v58 = vld [vmem:[#allocation2 + $0x28] sm:$0xff]  ;;  %v502_v60 = vadd.f32 %v784_v34, %v487_v57  ;;  %v509_v1 = vmax.f32 %v501_v59, 0.0 }
 0x113   : > { %v500_v61 = vadd.f32 %v784_v34, %v485_v58  ;;  %v507_v63 = vmax.f32 %v499_v56, 0.0 }
 0x114   : > { %v510_v62 = vmax.f32 %v502_v60, 0.0 }
 0x115   : > { %v508_v0 = vmax.f32 %v500_v61, 0.0 }
 0x116   : > { %v514_v3 = vpack.c.bf16 %v510_v62, %v509_v1 }
 0x117   : > { %v513_v2 = vpack.c.bf16 %v508_v0, %v507_v63 }
 0x119   : > { %859 = vmatprep.mubr.msk.bf16.mxu1 %vm282_vm0, %v513_v2 }
 0x11a   : > { %860 = vmatmul.mubr.msk.bf16.gmra.mrb[4].mxu1 %vm282_vm0, %v514_v3 }
 0x1e5   : > { %v857_v4 = vpop.f32.mrb[0].mxu1 }
 0x1e6   : > { %v803_v5 = vpack.c.bf16 %v857_v4, %v857_v4  ;;  %v577_v6 = vpop.f32.mrb[1].mxu1 }
 0x1e7   : > { %v801_v7 = vpack.c.bf16 %v577_v6, %v577_v6  ;;  %v858_v8 = vpop.f32.mrb[2].mxu1 }
 0x1e8   : > { %643 = vst.msk [vmem:[%s275_s8 + $0x8] sm:$0xf] %vm640_vm1, %v803_v5  ;;  %v804_v9 = vpack.c.bf16 %v858_v8, %v858_v8  ;;  %v580_v10 = vpop.f32.mrb[3].mxu1 }
 0x1e9   : > { %641 = vst.msk [vmem:[%s275_s8] sm:$0xf] %vm640_vm1, %v801_v7  ;;  %v802_v11 = vpack.c.bf16 %v580_v10, %v580_v10 }
 0x1ea   : > { %644 = vst.msk [vmem:[%s275_s8 + $0xc] sm:$0xf] %vm640_vm1, %v804_v9 }
 0x1eb   : > { %642 = vst.msk [vmem:[%s275_s8 + $0x4] sm:$0xf] %vm640_vm1, %v802_v11 }
 0x1ed   : > { %v861_v12 = vpop.f32.mrb[4].mxu1 }
 0x1ee   : > { %v807_v13 = vpack.c.bf16 %v861_v12, %v861_v12  ;;  %v593_v14 = vpop.f32.mrb[5].mxu1 }
 0x1ef   : > { %v805_v15 = vpack.c.bf16 %v593_v14, %v593_v14  ;;  %v862_v16 = vpop.f32.mrb[6].mxu1 }
 0x1f0   : > { %647 = vst.msk [vmem:[%s275_s8 + $0x18] sm:$0xf] %vm640_vm1, %v807_v13  ;;  %v808_v17 = vpack.c.bf16 %v862_v16, %v862_v16  ;;  %v596_v18 = vpop.f32.mrb[7].mxu1 }
 0x1f1   : > { %645 = vst.msk [vmem:[%s275_s8 + $0x10] sm:$0xf] %vm640_vm1, %v805_v15  ;;  %v806_v19 = vpack.c.bf16 %v596_v18, %v596_v18 }
 0x1f2   : > { %648 = vst.msk [vmem:[%s275_s8 + $0x1c] sm:$0xf] %vm640_vm1, %v808_v17 }
 0x1f3   : > { %646 = vst.msk [vmem:[%s275_s8 + $0x14] sm:$0xf] %vm640_vm1, %v806_v19 }
 0x1f4 PF: > { %s14_s19 = sadd.s32 1, %s956_s19   ;;  %s1114_s15 = smov %s948_s17 }
 0x1f5   : > { %p11_p7 = scmp.ge.s32.totalorder %s14_s19, 6   ;;  %s1115_s16 = smov %s952_s18 }
 0x1f6   : > { %s1116_s17 = smov %s1119_s20  ;;  %s1117_s18 = smov %s1123_s21 }
 0x1f7   :  { %13 = sbr.rel (!%p11_p7) target bundleno = 3 (0x3), region = 77 }

</bundles_post_ra>
